<compile_context>
chip_gen: v7x
topology: tpu7x:2x2x1
jax: 0.10.0
libtpu: 0.0.40
codegen_flags: <defaults>
</compile_context>

<pallas_src>
import jax
import jax.numpy as jnp
from jax.experimental import pallas as pl
from jax.experimental.pallas import tpu as pltpu

NEG_SLOPE = 0.01   # PyTorch nn.LeakyReLU default negative_slope
LANE = 128
Y_PAD = 128        # lane-dense width of the padded final-layer output slab


def _round_up(x, m):
    return (x + m - 1) // m * m


def _leaky_relu(v):
    # max(v, a*v) == LeakyReLU for 0 < a < 1 (2 VALU ops vs. cmp+select's 3).
    return jnp.maximum(v, NEG_SLOPE * v)


def fc_disc_kernel(adj_ref,
                   w1_ref, b1_ref,
                   w2_ref, b2_ref,
                   w3_ref, b3_ref,
                   wf_ref, bf_ref,
                   y_ref, x_ref):
    """Fused 4-layer MLP for one batch tile.

    Matmul operands are bf16 (MXU-friendly, half the traffic); accumulation,
    bias adds and activations are f32.
    """
    h0 = adj_ref[...]                                                      # (TB, Np) bf16

    h1 = jnp.dot(h0, w1_ref[...], preferred_element_type=jnp.float32)     # (TB, Lp)
    h1 = _leaky_relu(h1 + b1_ref[...])                                     # Dropout = id

    h2 = jnp.dot(h1.astype(jnp.bfloat16), w2_ref[...],
                 preferred_element_type=jnp.float32)                       # (TB, L2p)
    h2 = _leaky_relu(h2 + b2_ref[...])                                     # Dropout = id

    h3 = jnp.dot(h2.astype(jnp.bfloat16), w3_ref[...],
                 preferred_element_type=jnp.float32)                       # (TB, Lp)
    x = jax.nn.sigmoid(h3 + b3_ref[...])

    # Final Linear(L -> 1) emitted as a lane-dense (TB, 128) slab: wf/bf are
    # zero-padded to 128 columns, so column 0 carries y and columns 1..127 are
    # zero.  This keeps the store unmasked instead of a last-dim-1 vst.msk.
    y = jnp.dot(x.astype(jnp.bfloat16), wf_ref[...],
                preferred_element_type=jnp.float32) + bf_ref[...]

    x_ref[...] = x.astype(x_ref.dtype)
    y_ref[...] = y.astype(y_ref.dtype)


def _build_call(Bp, Np, Lp, L2p, tb, *, single_buffer_weights):
    """Builds the pallas_call for given (padded) shapes and batch tile."""
    if single_buffer_weights:
        # Weight/bias blocks have a constant index_map -> one buffer is enough
        # (halves weight VMEM vs. the default double-buffering).
        def const(shape):
            return pl.BlockSpec(shape, lambda i: (0, 0),
                                pipeline_mode=pl.Buffered(buffer_count=1))
    else:
        def const(shape):
            return pl.BlockSpec(shape, lambda i: (0, 0))

    grid_spec = pltpu.PrefetchScalarGridSpec(
        num_scalar_prefetch=0,
        grid=(Bp // tb,),                               # "parallel" -> megacore shards it
        in_specs=[
            pl.BlockSpec((tb, Np), lambda i: (i, 0)),   # adj batch tile (bf16)
            const((Np, Lp)),  const((1, Lp)),           # W1, b1
            const((Lp, L2p)), const((1, L2p)),          # W2, b2
            const((L2p, Lp)), const((1, Lp)),           # W3, b3
            const((Lp, Y_PAD)), const((1, Y_PAD)),      # Wf (lane-padded), bf
        ],
        out_specs=[
            pl.BlockSpec((tb, Y_PAD), lambda i: (i, 0)),  # y slab (col 0 = y)
            pl.BlockSpec((tb, Lp),    lambda i: (i, 0)),  # x
        ],
    )
    return pl.pallas_call(
        fc_disc_kernel,
        out_shape=(jax.ShapeDtypeStruct((Bp, Y_PAD), jnp.float32),
                   jax.ShapeDtypeStruct((Bp, Lp), jnp.float32)),
        grid_spec=grid_spec,
        compiler_params=pltpu.CompilerParams(
            dimension_semantics=("parallel",),
            vmem_limit_bytes=32 * 1024 * 1024),
    )


def fc_discriminator(adj, params, *, tb=256):
    """adj: (B, num_nodes) f32.  params: (w1,b1,...,wf,bf) with weights stored
    as (in_features, out_features) f32 and biases as (out_features,) f32.
    Returns (y: (B, 1) f32, x: (B, layer_size) f32)."""
    B, N = adj.shape
    w1, b1, w2, b2, w3, b3, wf, bf = params
    L, L2 = w1.shape[1], w2.shape[1]

    # Pad feature dims to multiples of 128 (lane-dense, unmasked vld/vst) and
    # the batch to a multiple of 16 (bf16 sublane packing).  Zero padding of
    # weights/biases is exact: padded columns/rows contribute nothing to the
    # un-padded outputs, and padded rows/cols are sliced off below.
    Np, Lp, L2p = _round_up(N, LANE), _round_up(L, LANE), _round_up(L2, LANE)
    tb_eff = min(tb, _round_up(B, 16))
    Bp = _round_up(B, tb_eff)

    def pad2(a, r, c):
        return jnp.pad(a, ((0, r - a.shape[0]), (0, c - a.shape[1])))

    adj_p = pad2(adj, Bp, Np).astype(jnp.bfloat16)
    w1p = pad2(w1, Np, Lp).astype(jnp.bfloat16)
    w2p = pad2(w2, Lp, L2p).astype(jnp.bfloat16)
    w3p = pad2(w3, L2p, Lp).astype(jnp.bfloat16)
    wfp = pad2(wf, Lp, Y_PAD).astype(jnp.bfloat16)     # (L,1) -> (Lp,128), col 0 = wf
    b1p = pad2(b1[None, :], 1, Lp)
    b2p = pad2(b2[None, :], 1, L2p)
    b3p = pad2(b3[None, :], 1, Lp)
    bfp = pad2(bf[None, :], 1, Y_PAD)

    args = (adj_p, w1p, b1p, w2p, b2p, w3p, b3p, wfp, bfp)
    try:
        y_pad, x_pad = _build_call(Bp, Np, Lp, L2p, tb_eff,
                                   single_buffer_weights=True)(*args)
    except Exception:
        # Fallback for jax versions without pipeline_mode=pl.Buffered support.
        y_pad, x_pad = _build_call(Bp, Np, Lp, L2p, tb_eff,
                                   single_buffer_weights=False)(*args)

    return y_pad[:B, :1], x_pad[:B, :L]


def init_params(key, num_nodes, layer_size):
    """PyTorch-style init: U(-1/sqrt(fan_in), 1/sqrt(fan_in)).
    Weights stored transposed as (in, out); biases as (out,)."""
    dims = [(num_nodes, layer_size),
            (layer_size, layer_size * 2),
            (layer_size * 2, layer_size),
            (layer_size, 1)]
    params = []
    for fan_in, fan_out in dims:
        key, kw, kb = jax.random.split(key, 3)
        bound = 1.0 / jnp.sqrt(float(fan_in))
        w = jax.random.uniform(kw, (fan_in, fan_out), jnp.float32, -bound, bound)
        b = jax.random.uniform(kb, (fan_out,), jnp.float32, -bound, bound)
        params += [w, b]
    return tuple(params)


def reference_forward(adj, params):
    """Pure-XLA reference mirroring the kernel numerics (bf16 matmul operands,
    f32 accumulation / bias / activations)."""
    w1, b1, w2, b2, w3, b3, wf, bf = params

    def mm(a, w):
        return jnp.dot(a.astype(jnp.bfloat16), w.astype(jnp.bfloat16),
                       preferred_element_type=jnp.float32)

    h1 = _leaky_relu(mm(adj, w1) + b1)
    h2 = _leaky_relu(mm(h1, w2) + b2)
    x = jax.nn.sigmoid(mm(h2, w3) + b3)
    y = mm(x, wf) + bf
    return y, x


if __name__ == "__main__":
    # Small shapes consistent with the module; num_nodes=200 exercises the
    # 128-padding path (200 -> 256) and B=48 exercises ragged-batch handling.
    B, NUM_NODES, LAYER_SIZE = 48, 200, 128

    key = jax.random.PRNGKey(0)
    key, kx = jax.random.split(key)
    adj = jax.random.normal(kx, (B, NUM_NODES), jnp.float32)
    params = init_params(key, NUM_NODES, LAYER_SIZE)

    y, x = fc_discriminator(adj, params)
    jax.block_until_ready((y, x))

    y_ref, x_ref = reference_forward(adj, params)
    assert y.shape == (B, 1) and x.shape == (B, LAYER_SIZE)
    assert jnp.allclose(y, y_ref, atol=1e-3, rtol=1e-3), \
        float(jnp.max(jnp.abs(y - y_ref)))
    assert jnp.allclose(x, x_ref, atol=1e-3, rtol=1e-3), \
        float(jnp.max(jnp.abs(x - x_ref)))

    print("KERNEL_OK")
</pallas_src>

<mosaic_0001>
module attributes {stable_mosaic.version = 11 : i64} {
  func.func @fc_disc_kernel(%arg0: i32, %arg1: memref<48x256xbf16, #tpu.memory_space<vmem>>, %arg2: memref<256x128xbf16, #tpu.memory_space<vmem>>, %arg3: memref<1x128xf32, #tpu.memory_space<vmem>>, %arg4: memref<128x256xbf16, #tpu.memory_space<vmem>>, %arg5: memref<1x256xf32, #tpu.memory_space<vmem>>, %arg6: memref<256x128xbf16, #tpu.memory_space<vmem>>, %arg7: memref<1x128xf32, #tpu.memory_space<vmem>>, %arg8: memref<128x128xbf16, #tpu.memory_space<vmem>>, %arg9: memref<1x128xf32, #tpu.memory_space<vmem>>, %arg10: memref<48x128xf32, #tpu.memory_space<vmem>>, %arg11: memref<48x128xf32, #tpu.memory_space<vmem>>) attributes {dimension_semantics = [#tpu.dimension_semantics<parallel>], iteration_bounds = array<i64: 1>, scalar_prefetch = 0 : i64, scratch_operands = 0 : i64, tpu.core_type = #tpu.core_type<tc>, window_params = [{transform_indices = @transform_0, window_bounds = array<i64: 48, 256>}, {pipeline_mode = #tpu.pipeline_mode<synchronous>, transform_indices = @transform_1, window_bounds = array<i64: 256, 128>}, {pipeline_mode = #tpu.pipeline_mode<synchronous>, transform_indices = @transform_2, window_bounds = array<i64: 1, 128>}, {pipeline_mode = #tpu.pipeline_mode<synchronous>, transform_indices = @transform_3, window_bounds = array<i64: 128, 256>}, {pipeline_mode = #tpu.pipeline_mode<synchronous>, transform_indices = @transform_4, window_bounds = array<i64: 1, 256>}, {pipeline_mode = #tpu.pipeline_mode<synchronous>, transform_indices = @transform_5, window_bounds = array<i64: 256, 128>}, {pipeline_mode = #tpu.pipeline_mode<synchronous>, transform_indices = @transform_6, window_bounds = array<i64: 1, 128>}, {pipeline_mode = #tpu.pipeline_mode<synchronous>, transform_indices = @transform_7, window_bounds = array<i64: 128, 128>}, {pipeline_mode = #tpu.pipeline_mode<synchronous>, transform_indices = @transform_8, window_bounds = array<i64: 1, 128>}, {transform_indices = @transform_9, window_bounds = array<i64: 48, 128>}, {transform_indices = @transform_10, window_bounds = array<i64: 48, 128>}]} {
    %c0 = arith.constant 0 : index
    %c0_0 = arith.constant 0 : index
    %0 = vector.load %arg1[%c0, %c0_0] : memref<48x256xbf16, #tpu.memory_space<vmem>>, vector<48x256xbf16>
    %c0_1 = arith.constant 0 : index
    %c0_2 = arith.constant 0 : index
    %1 = vector.load %arg2[%c0_1, %c0_2] : memref<256x128xbf16, #tpu.memory_space<vmem>>, vector<256x128xbf16>
    %cst = arith.constant dense<0.000000e+00> : vector<48x128xf32>
    %2 = tpu.matmul %0, %1, %cst {dimension_numbers = #tpu.dot_dimension_numbers<[1], [0], [0], [1], [0, 0, 1, 1], [], []>} : vector<48x256xbf16>, vector<256x128xbf16>, vector<48x128xf32> -> vector<48x128xf32>
    %c0_3 = arith.constant 0 : index
    %c0_4 = arith.constant 0 : index
    %3 = vector.load %arg3[%c0_3, %c0_4] : memref<1x128xf32, #tpu.memory_space<vmem>>, vector<1x128xf32>
    %4 = vector.broadcast %3 : vector<1x128xf32> to vector<48x128xf32>
    %5 = arith.addf %2, %4 : vector<48x128xf32>
    %cst_5 = arith.constant 0.00999999977 : f32
    %6 = vector.broadcast %cst_5 : f32 to vector<48x128xf32>
    %7 = arith.mulf %6, %5 : vector<48x128xf32>
    %8 = arith.maximumf %5, %7 : vector<48x128xf32>
    %9 = arith.truncf %8 : vector<48x128xf32> to vector<48x128xbf16>
    %c0_6 = arith.constant 0 : index
    %c0_7 = arith.constant 0 : index
    %10 = vector.load %arg4[%c0_6, %c0_7] : memref<128x256xbf16, #tpu.memory_space<vmem>>, vector<128x256xbf16>
    %cst_8 = arith.constant dense<0.000000e+00> : vector<48x256xf32>
    %11 = tpu.matmul %9, %10, %cst_8 {dimension_numbers = #tpu.dot_dimension_numbers<[1], [0], [0], [1], [0, 0, 1, 1], [], []>} : vector<48x128xbf16>, vector<128x256xbf16>, vector<48x256xf32> -> vector<48x256xf32>
    %c0_9 = arith.constant 0 : index
    %c0_10 = arith.constant 0 : index
    %12 = vector.load %arg5[%c0_9, %c0_10] : memref<1x256xf32, #tpu.memory_space<vmem>>, vector<1x256xf32>
    %13 = vector.broadcast %12 : vector<1x256xf32> to vector<48x256xf32>
    %14 = arith.addf %11, %13 : vector<48x256xf32>
    %cst_11 = arith.constant 0.00999999977 : f32
    %15 = vector.broadcast %cst_11 : f32 to vector<48x256xf32>
    %16 = arith.mulf %15, %14 : vector<48x256xf32>
    %17 = arith.maximumf %14, %16 : vector<48x256xf32>
    %18 = arith.truncf %17 : vector<48x256xf32> to vector<48x256xbf16>
    %c0_12 = arith.constant 0 : index
    %c0_13 = arith.constant 0 : index
    %19 = vector.load %arg6[%c0_12, %c0_13] : memref<256x128xbf16, #tpu.memory_space<vmem>>, vector<256x128xbf16>
    %cst_14 = arith.constant dense<0.000000e+00> : vector<48x128xf32>
    %20 = tpu.matmul %18, %19, %cst_14 {dimension_numbers = #tpu.dot_dimension_numbers<[1], [0], [0], [1], [0, 0, 1, 1], [], []>} : vector<48x256xbf16>, vector<256x128xbf16>, vector<48x128xf32> -> vector<48x128xf32>
    %c0_15 = arith.constant 0 : index
    %c0_16 = arith.constant 0 : index
    %21 = vector.load %arg7[%c0_15, %c0_16] : memref<1x128xf32, #tpu.memory_space<vmem>>, vector<1x128xf32>
    %22 = vector.broadcast %21 : vector<1x128xf32> to vector<48x128xf32>
    %23 = arith.addf %20, %22 : vector<48x128xf32>
    %24 = arith.negf %23 : vector<48x128xf32>
    %25 = math.exp %24 : vector<48x128xf32>
    %cst_17 = arith.constant 1.000000e+00 : f32
    %26 = vector.broadcast %cst_17 : f32 to vector<48x128xf32>
    %27 = arith.addf %26, %25 : vector<48x128xf32>
    %28 = arith.divf %26, %27 : vector<48x128xf32>
    %29 = arith.truncf %28 : vector<48x128xf32> to vector<48x128xbf16>
    %c0_18 = arith.constant 0 : index
    %c0_19 = arith.constant 0 : index
    %30 = vector.load %arg8[%c0_18, %c0_19] : memref<128x128xbf16, #tpu.memory_space<vmem>>, vector<128x128xbf16>
    %cst_20 = arith.constant dense<0.000000e+00> : vector<48x128xf32>
    %31 = tpu.matmul %29, %30, %cst_20 {dimension_numbers = #tpu.dot_dimension_numbers<[1], [0], [0], [1], [0, 0, 1, 1], [], []>} : vector<48x128xbf16>, vector<128x128xbf16>, vector<48x128xf32> -> vector<48x128xf32>
    %c0_21 = arith.constant 0 : index
    %c0_22 = arith.constant 0 : index
    %32 = vector.load %arg9[%c0_21, %c0_22] : memref<1x128xf32, #tpu.memory_space<vmem>>, vector<1x128xf32>
    %33 = vector.broadcast %32 : vector<1x128xf32> to vector<48x128xf32>
    %34 = arith.addf %31, %33 : vector<48x128xf32>
    %c0_23 = arith.constant 0 : index
    %c0_24 = arith.constant 0 : index
    %35 = vector.load %arg11[%c0_23, %c0_24] : memref<48x128xf32, #tpu.memory_space<vmem>>, vector<48x128xf32>
    tpu.vector_store %arg11[%c0_23, %c0_24], %28 {strides = array<i32>} : memref<48x128xf32, #tpu.memory_space<vmem>>, vector<48x128xf32>,
    %c0_25 = arith.constant 0 : index
    %c0_26 = arith.constant 0 : index
    %36 = vector.load %arg10[%c0_25, %c0_26] : memref<48x128xf32, #tpu.memory_space<vmem>>, vector<48x128xf32>
    tpu.vector_store %arg10[%c0_25, %c0_26], %34 {strides = array<i32>} : memref<48x128xf32, #tpu.memory_space<vmem>>, vector<48x128xf32>,
    return
  }
  func.func @transform_0(%arg0: i32) -> (i32, i32) {
    %c0_i32 = arith.constant 0 : i32
    %c0_i32_0 = arith.constant 0 : i32
    return %arg0, %c0_i32 : i32, i32
  }
  func.func @transform_1(%arg0: i32) -> (i32, i32) {
    %c0_i32 = arith.constant 0 : i32
    %c0_i32_0 = arith.constant 0 : i32
    %c0_i32_1 = arith.constant 0 : i32
    return %c0_i32, %c0_i32_0 : i32, i32
  }
  func.func @transform_2(%arg0: i32) -> (i32, i32) {
    %c0_i32 = arith.constant 0 : i32
    %c0_i32_0 = arith.constant 0 : i32
    %c0_i32_1 = arith.constant 0 : i32
    return %c0_i32, %c0_i32_0 : i32, i32
  }
  func.func @transform_3(%arg0: i32) -> (i32, i32) {
    %c0_i32 = arith.constant 0 : i32
    %c0_i32_0 = arith.constant 0 : i32
    %c0_i32_1 = arith.constant 0 : i32
    return %c0_i32, %c0_i32_0 : i32, i32
  }
  func.func @transform_4(%arg0: i32) -> (i32, i32) {
    %c0_i32 = arith.constant 0 : i32
    %c0_i32_0 = arith.constant 0 : i32
    %c0_i32_1 = arith.constant 0 : i32
    return %c0_i32, %c0_i32_0 : i32, i32
  }
  func.func @transform_5(%arg0: i32) -> (i32, i32) {
    %c0_i32 = arith.constant 0 : i32
    %c0_i32_0 = arith.constant 0 : i32
    %c0_i32_1 = arith.constant 0 : i32
    return %c0_i32, %c0_i32_0 : i32, i32
  }
  func.func @transform_6(%arg0: i32) -> (i32, i32) {
    %c0_i32 = arith.constant 0 : i32
    %c0_i32_0 = arith.constant 0 : i32
    %c0_i32_1 = arith.constant 0 : i32
    return %c0_i32, %c0_i32_0 : i32, i32
  }
  func.func @transform_7(%arg0: i32) -> (i32, i32) {
    %c0_i32 = arith.constant 0 : i32
    %c0_i32_0 = arith.constant 0 : i32
    %c0_i32_1 = arith.constant 0 : i32
    return %c0_i32, %c0_i32_0 : i32, i32
  }
  func.func @transform_8(%arg0: i32) -> (i32, i32) {
    %c0_i32 = arith.constant 0 : i32
    %c0_i32_0 = arith.constant 0 : i32
    %c0_i32_1 = arith.constant 0 : i32
    return %c0_i32, %c0_i32_0 : i32, i32
  }
  func.func @transform_9(%arg0: i32) -> (i32, i32) {
    %c0_i32 = arith.constant 0 : i32
    %c0_i32_0 = arith.constant 0 : i32
    return %arg0, %c0_i32 : i32, i32
  }
  func.func @transform_10(%arg0: i32) -> (i32, i32) {
    %c0_i32 = arith.constant 0 : i32
    %c0_i32_0 = arith.constant 0 : i32
    return %arg0, %c0_i32 : i32, i32
  }
}

module attributes {stable_mosaic.version = 11 : i64} {
  func.func @fc_disc_kernel(%arg0: i32, %arg1: memref<48x256xbf16, #tpu.memory_space<vmem>>, %arg2: memref<256x128xbf16, #tpu.memory_space<vmem>>, %arg3: memref<1x128xf32, #tpu.memory_space<vmem>>, %arg4: memref<128x256xbf16, #tpu.memory_space<vmem>>, %arg5: memref<1x256xf32, #tpu.memory_space<vmem>>, %arg6: memref<256x128xbf16, #tpu.memory_space<vmem>>, %arg7: memref<1x128xf32, #tpu.memory_space<vmem>>, %arg8: memref<128x128xbf16, #tpu.memory_space<vmem>>, %arg9: memref<1x128xf32, #tpu.memory_space<vmem>>, %arg10: memref<48x128xf32, #tpu.memory_space<vmem>>, %arg11: memref<48x128xf32, #tpu.memory_space<vmem>>) attributes {dimension_semantics = [#tpu.dimension_semantics<parallel>], iteration_bounds = array<i64: 1>, scalar_prefetch = 0 : i64, scratch_operands = 0 : i64, tpu.core_type = #tpu.core_type<tc>, window_params = [{transform_indices = @transform_0, window_bounds = array<i64: 48, 256>}, {pipeline_mode = #tpu.pipeline_mode<synchronous>, transform_indices = @transform_1, window_bounds = array<i64: 256, 128>}, {pipeline_mode = #tpu.pipeline_mode<synchronous>, transform_indices = @transform_2, window_bounds = array<i64: 1, 128>}, {pipeline_mode = #tpu.pipeline_mode<synchronous>, transform_indices = @transform_3, window_bounds = array<i64: 128, 256>}, {pipeline_mode = #tpu.pipeline_mode<synchronous>, transform_indices = @transform_4, window_bounds = array<i64: 1, 256>}, {pipeline_mode = #tpu.pipeline_mode<synchronous>, transform_indices = @transform_5, window_bounds = array<i64: 256, 128>}, {pipeline_mode = #tpu.pipeline_mode<synchronous>, transform_indices = @transform_6, window_bounds = array<i64: 1, 128>}, {pipeline_mode = #tpu.pipeline_mode<synchronous>, transform_indices = @transform_7, window_bounds = array<i64: 128, 128>}, {pipeline_mode = #tpu.pipeline_mode<synchronous>, transform_indices = @transform_8, window_bounds = array<i64: 1, 128>}, {transform_indices = @transform_9, window_bounds = array<i64: 48, 128>}, {transform_indices = @transform_10, window_bounds = array<i64: 48, 128>}]} {
    %c0 = arith.constant 0 : index
    %c0_0 = arith.constant 0 : index
    %0 = vector.load %arg1[%c0, %c0_0] : memref<48x256xbf16, #tpu.memory_space<vmem>>, vector<48x256xbf16>
    %c0_1 = arith.constant 0 : index
    %c0_2 = arith.constant 0 : index
    %1 = vector.load %arg2[%c0_1, %c0_2] : memref<256x128xbf16, #tpu.memory_space<vmem>>, vector<256x128xbf16>
    %cst = arith.constant dense<0.000000e+00> : vector<48x128xf32>
    %2 = tpu.matmul %0, %1, %cst {dimension_numbers = #tpu.dot_dimension_numbers<[1], [0], [0], [1], [0, 0, 1, 1], [], []>} : vector<48x256xbf16>, vector<256x128xbf16>, vector<48x128xf32> -> vector<48x128xf32>
    %c0_3 = arith.constant 0 : index
    %c0_4 = arith.constant 0 : index
    %3 = vector.load %arg3[%c0_3, %c0_4] : memref<1x128xf32, #tpu.memory_space<vmem>>, vector<1x128xf32>
    %4 = vector.broadcast %3 : vector<1x128xf32> to vector<48x128xf32>
    %5 = arith.addf %2, %4 : vector<48x128xf32>
    %cst_5 = arith.constant 0.00999999977 : f32
    %6 = vector.broadcast %cst_5 : f32 to vector<48x128xf32>
    %7 = arith.mulf %6, %5 : vector<48x128xf32>
    %8 = arith.maximumf %5, %7 : vector<48x128xf32>
    %9 = arith.truncf %8 : vector<48x128xf32> to vector<48x128xbf16>
    %c0_6 = arith.constant 0 : index
    %c0_7 = arith.constant 0 : index
    %10 = vector.load %arg4[%c0_6, %c0_7] : memref<128x256xbf16, #tpu.memory_space<vmem>>, vector<128x256xbf16>
    %cst_8 = arith.constant dense<0.000000e+00> : vector<48x256xf32>
    %11 = tpu.matmul %9, %10, %cst_8 {dimension_numbers = #tpu.dot_dimension_numbers<[1], [0], [0], [1], [0, 0, 1, 1], [], []>} : vector<48x128xbf16>, vector<128x256xbf16>, vector<48x256xf32> -> vector<48x256xf32>
    %c0_9 = arith.constant 0 : index
    %c0_10 = arith.constant 0 : index
    %12 = vector.load %arg5[%c0_9, %c0_10] : memref<1x256xf32, #tpu.memory_space<vmem>>, vector<1x256xf32>
    %13 = vector.broadcast %12 : vector<1x256xf32> to vector<48x256xf32>
    %14 = arith.addf %11, %13 : vector<48x256xf32>
    %cst_11 = arith.constant 0.00999999977 : f32
    %15 = vector.broadcast %cst_11 : f32 to vector<48x256xf32>
    %16 = arith.mulf %15, %14 : vector<48x256xf32>
    %17 = arith.maximumf %14, %16 : vector<48x256xf32>
    %18 = arith.truncf %17 : vector<48x256xf32> to vector<48x256xbf16>
    %c0_12 = arith.constant 0 : index
    %c0_13 = arith.constant 0 : index
    %19 = vector.load %arg6[%c0_12, %c0_13] : memref<256x128xbf16, #tpu.memory_space<vmem>>, vector<256x128xbf16>
    %cst_14 = arith.constant dense<0.000000e+00> : vector<48x128xf32>
    %20 = tpu.matmul %18, %19, %cst_14 {dimension_numbers = #tpu.dot_dimension_numbers<[1], [0], [0], [1], [0, 0, 1, 1], [], []>} : vector<48x256xbf16>, vector<256x128xbf16>, vector<48x128xf32> -> vector<48x128xf32>
    %c0_15 = arith.constant 0 : index
    %c0_16 = arith.constant 0 : index
    %21 = vector.load %arg7[%c0_15, %c0_16] : memref<1x128xf32, #tpu.memory_space<vmem>>, vector<1x128xf32>
    %22 = vector.broadcast %21 : vector<1x128xf32> to vector<48x128xf32>
    %23 = arith.addf %20, %22 : vector<48x128xf32>
    %24 = arith.negf %23 : vector<48x128xf32>
    %25 = math.exp %24 : vector<48x128xf32>
    %cst_17 = arith.constant 1.000000e+00 : f32
    %26 = vector.broadcast %cst_17 : f32 to vector<48x128xf32>
    %27 = arith.addf %26, %25 : vector<48x128xf32>
    %28 = arith.divf %26, %27 : vector<48x128xf32>
    %29 = arith.truncf %28 : vector<48x128xf32> to vector<48x128xbf16>
    %c0_18 = arith.constant 0 : index
    %c0_19 = arith.constant 0 : index
    %30 = vector.load %arg8[%c0_18, %c0_19] : memref<128x128xbf16, #tpu.memory_space<vmem>>, vector<128x128xbf16>
    %cst_20 = arith.constant dense<0.000000e+00> : vector<48x128xf32>
    %31 = tpu.matmul %29, %30, %cst_20 {dimension_numbers = #tpu.dot_dimension_numbers<[1], [0], [0], [1], [0, 0, 1, 1], [], []>} : vector<48x128xbf16>, vector<128x128xbf16>, vector<48x128xf32> -> vector<48x128xf32>
    %c0_21 = arith.constant 0 : index
    %c0_22 = arith.constant 0 : index
    %32 = vector.load %arg9[%c0_21, %c0_22] : memref<1x128xf32, #tpu.memory_space<vmem>>, vector<1x128xf32>
    %33 = vector.broadcast %32 : vector<1x128xf32> to vector<48x128xf32>
    %34 = arith.addf %31, %33 : vector<48x128xf32>
    %c0_23 = arith.constant 0 : index
    %c0_24 = arith.constant 0 : index
    %35 = vector.load %arg11[%c0_23, %c0_24] : memref<48x128xf32, #tpu.memory_space<vmem>>, vector<48x128xf32>
    tpu.vector_store %arg11[%c0_23, %c0_24], %28 {strides = array<i32>} : memref<48x128xf32, #tpu.memory_space<vmem>>, vector<48x128xf32>,
    %c0_25 = arith.constant 0 : index
    %c0_26 = arith.constant 0 : index
    %36 = vector.load %arg10[%c0_25, %c0_26] : memref<48x128xf32, #tpu.memory_space<vmem>>, vector<48x128xf32>
    tpu.vector_store %arg10[%c0_25, %c0_26], %34 {strides = array<i32>} : memref<48x128xf32, #tpu.memory_space<vmem>>, vector<48x128xf32>,
    return
  }
  func.func @transform_0(%arg0: i32) -> (i32, i32) {
    %c0_i32 = arith.constant 0 : i32
    %c0_i32_0 = arith.constant 0 : i32
    return %arg0, %c0_i32 : i32, i32
  }
  func.func @transform_1(%arg0: i32) -> (i32, i32) {
    %c0_i32 = arith.constant 0 : i32
    %c0_i32_0 = arith.constant 0 : i32
    %c0_i32_1 = arith.constant 0 : i32
    return %c0_i32, %c0_i32_0 : i32, i32
  }
  func.func @transform_2(%arg0: i32) -> (i32, i32) {
    %c0_i32 = arith.constant 0 : i32
    %c0_i32_0 = arith.constant 0 : i32
    %c0_i32_1 = arith.constant 0 : i32
    return %c0_i32, %c0_i32_0 : i32, i32
  }
  func.func @transform_3(%arg0: i32) -> (i32, i32) {
    %c0_i32 = arith.constant 0 : i32
    %c0_i32_0 = arith.constant 0 : i32
    %c0_i32_1 = arith.constant 0 : i32
    return %c0_i32, %c0_i32_0 : i32, i32
  }
  func.func @transform_4(%arg0: i32) -> (i32, i32) {
    %c0_i32 = arith.constant 0 : i32
    %c0_i32_0 = arith.constant 0 : i32
    %c0_i32_1 = arith.constant 0 : i32
    return %c0_i32, %c0_i32_0 : i32, i32
  }
  func.func @transform_5(%arg0: i32) -> (i32, i32) {
    %c0_i32 = arith.constant 0 : i32
    %c0_i32_0 = arith.constant 0 : i32
    %c0_i32_1 = arith.constant 0 : i32
    return %c0_i32, %c0_i32_0 : i32, i32
  }
  func.func @transform_6(%arg0: i32) -> (i32, i32) {
    %c0_i32 = arith.constant 0 : i32
    %c0_i32_0 = arith.constant 0 : i32
    %c0_i32_1 = arith.constant 0 : i32
    return %c0_i32, %c0_i32_0 : i32, i32
  }
  func.func @transform_7(%arg0: i32) -> (i32, i32) {
    %c0_i32 = arith.constant 0 : i32
    %c0_i32_0 = arith.constant 0 : i32
    %c0_i32_1 = arith.constant 0 : i32
    return %c0_i32, %c0_i32_0 : i32, i32
  }
  func.func @transform_8(%arg0: i32) -> (i32, i32) {
    %c0_i32 = arith.constant 0 : i32
    %c0_i32_0 = arith.constant 0 : i32
    %c0_i32_1 = arith.constant 0 : i32
    return %c0_i32, %c0_i32_0 : i32, i32
  }
  func.func @transform_9(%arg0: i32) -> (i32, i32) {
    %c0_i32 = arith.constant 0 : i32
    %c0_i32_0 = arith.constant 0 : i32
    return %arg0, %c0_i32 : i32, i32
  }
  func.func @transform_10(%arg0: i32) -> (i32, i32) {
    %c0_i32 = arith.constant 0 : i32
    %c0_i32_0 = arith.constant 0 : i32
    return %arg0, %c0_i32 : i32, i32
  }
}

</mosaic_0001>

<bundles_post_ra>
// kernel: tpu_custom_call.1
= control target key start
LH: loop header
LB: loop body
LE: loop exit
PB: predicated region body
PF: predicated region fallthrough
CT: control target
= control target key end

     0   :  { %16 = vsyncpa [#allocation3], 0  ;;  %s1608_s0 = inlined_call_operand.hbm [shape: bf16[48,256], index: 0, kind: input, shape index: {}]   ;;  %s1609_s1 = inlined_call_operand.hbm [shape: bf16[256,128], index: 1, kind: input, shape index: {}]   ;;  %s1610_s2 = inlined_call_operand.vmem [shape: f32[1,128], index: 2, kind: input, shape index: {}]   ;;  %s1611_s3 = inlined_call_operand.hbm [shape: bf16[128,256], index: 3, kind: input, shape index: {}]   ;;  %s1612_s4 = inlined_call_operand.vmem [shape: f32[1,256], index: 4, kind: input, shape index: {}]   ;;  %s1613_s5 = inlined_call_operand.hbm [shape: bf16[256,128], index: 5, kind: input, shape index: {}]   ;;  %s1614_s6 = inlined_call_operand.vmem [shape: f32[1,128], index: 6, kind: input, shape index: {}]   ;;  %s1615_s7 = inlined_call_operand.hbm [shape: bf16[128,128], index: 7, kind: input, shape index: {}]   ;;  %s1616_s8 = inlined_call_operand.vmem [shape: f32[1,128], index: 8, kind: input, shape index: {}]   ;;  %s1617_s9 = inlined_call_operand.hbm [shape: f32[48,128], index: 9, kind: output, shape index: {0}]   ;;  %s1618_s10 = inlined_call_operand.hbm [shape: f32[48,128], index: 10, kind: output, shape index: {1}]  }
   0x1   :  { %17 = vsyncpa [#allocation6], 0 }
   0x2   :  { %18 = vsyncpa [#allocation9], 0 }
   0x3   :  { %19 = vsyncpa [#allocation4], 0 }
   0x4   :  { %20 = vsyncpa [#allocation13], 0  ;;  %s1408_s13 = smov [#allocation5]   ;;  %s1244_s17 = scalar_lea.hbm %s1609_s1, 2048 }
   0x5   :  { %s38_s14 = sshll.u32 %s1408_s13, 4  ;;  %p1245_p0 = scmp.ne.s32.totalorder %s1609_s1, %s1244_s17  ;;  %s39_s14 = int_to_ptr.vmem [resolvable:$true] %s38_s14 }
   0x6   :  { %p1248_p1 = scmp.lt.u32.totalorder %s1244_s17, %s1609_s1 }
   0x8   :  { %p1250_p2 = pnand %p1248_p1, %p1245_p0 }
   0xa   :  { %1253 = shalt.err (!%p1250_p2)
}
   0xb   :  { %s1254_s22 = scalar_lea.vmem %s39_s14, 2048  ;;  %p1259_p4 = scmp.lt.s32.totalorder %s39_s14, %s39_s14 }
   0xc   :  { %p1255_p3 = scmp.ne.s32.totalorder %s39_s14, %s1254_s22  ;;  %p1260_p5 = scmp.lt.s32.totalorder %s1254_s22, %s1254_s22 }
   0xe   :  { %p1261_p6 = por %p1260_p5, %p1259_p4 }
  0x10   :  { %p1262_p7 = pnand %p1261_p6, %p1255_p3 }
  0x12   :  { %1265 = shalt.err (!%p1262_p7)
}
  0x13   :  { %s1409_s23 = smov 64   ;;  %s1410_s24 = smov 4  }
  0x14   :  { %44 = dma.hbm_to_vmem [thread:$0]  %s1609_s1, 2048, %s39_s14, [#allocation6], %s1409_s23, %s1409_s23, %s1410_s24  }
  0x15   :  { %s1411_s27 = smov [#allocation8]   ;;  %s1412_s29 = smov [#allocation2]  }
  0x16   :  { %s66_s28 = sshll.u32 %s1411_s27, 4  ;;  %s26_s30 = sshll.u32 %s1412_s29, 4  ;;  %s67_s28 = int_to_ptr.vmem [resolvable:$true] %s66_s28  ;;  %s27_s30 = int_to_ptr.vmem [resolvable:$true] %s26_s30 }
  0x17   :  { %s1266_s13 = scalar_lea.hbm %s1613_s5, 2048 }
  0x18   :  { %p1267_p8 = scmp.ne.s32.totalorder %s1613_s5, %s1266_s13  ;;  %p1270_p9 = scmp.lt.u32.totalorder %s1266_s13, %s1613_s5 }
  0x1a   :  { %p1272_p10 = pnand %p1270_p9, %p1267_p8 }
  0x1c   :  { %1275 = shalt.err (!%p1272_p10)
}
  0x1d   :  { %s1276_s1 = scalar_lea.vmem %s67_s28, 2048  ;;  %p1281_p12 = scmp.lt.s32.totalorder %s67_s28, %s67_s28 }
  0x1e   :  { %p1277_p11 = scmp.ne.s32.totalorder %s67_s28, %s1276_s1  ;;  %p1282_p13 = scmp.lt.s32.totalorder %s1276_s1, %s1276_s1 }
  0x20   :  { %p1283_p0 = por %p1282_p13, %p1281_p12 }
  0x22   :  { %p1284_p1 = pnand %p1283_p0, %p1277_p11 }
  0x24   :  { %1287 = shalt.err (!%p1284_p1)
}
  0x25   :  { %72 = dma.hbm_to_vmem [thread:$0]  %s1613_s5, 2048, %s67_s28, [#allocation9], %s1409_s23, %s1409_s23, %s1410_s24  }
  0x26   :  { %s1288_s22 = scalar_lea.hbm %s1608_s0, 768 }
  0x27   :  { %p1289_p2 = scmp.ne.s32.totalorder %s1608_s0, %s1288_s22  ;;  %p1292_p3 = scmp.lt.u32.totalorder %s1288_s22, %s1608_s0 }
  0x29   :  { %p1294_p4 = pnand %p1292_p3, %p1289_p2 }
  0x2b   :  { %1297 = shalt.err (!%p1294_p4)
}
  0x2c   :  { %s1298_s11 = scalar_lea.vmem %s27_s30, 768  ;;  %p1303_p6 = scmp.lt.s32.totalorder %s27_s30, %s27_s30 }
  0x2d   :  { %p1299_p5 = scmp.ne.s32.totalorder %s27_s30, %s1298_s11  ;;  %p1304_p7 = scmp.lt.s32.totalorder %s1298_s11, %s1298_s11 }
  0x2f   :  { %p1305_p8 = por %p1304_p7, %p1303_p6 }
  0x31   :  { %p1306_p9 = pnand %p1305_p8, %p1299_p5 }
  0x33   :  { %1309 = shalt.err (!%p1306_p9)
}
  0x34   :  { %s1413_s5 = smov 128   ;;  %s1414_s28 = smov 8  }
  0x35   :  { %32 = dma.hbm_to_vmem [thread:$0]  %s1608_s0, 768, %s27_s30, [#allocation3], %s1413_s5, %s1413_s5, %s1414_s28  }
  0x36   :  { %s1415_s15 = smov [#allocation7]   ;;  %s1416_s17 = smov [#allocation10]  }
  0x37   :  { %s52_s16 = sshll.u32 %s1415_s15, 4  ;;  %s80_s18 = sshll.u32 %s1416_s17, 4  ;;  %s53_s16 = int_to_ptr.vmem [resolvable:$true] %s52_s16  ;;  %s81_s18 = int_to_ptr.vmem [resolvable:$true] %s80_s18 }
  0x38   :  { %s1310_s19 = scalar_lea.hbm %s1611_s3, 2048 }
  0x39   :  { %p1311_p10 = scmp.ne.s32.totalorder %s1611_s3, %s1310_s19  ;;  %p1314_p11 = scmp.lt.u32.totalorder %s1310_s19, %s1611_s3 }
  0x3b   :  { %p1316_p12 = pnand %p1314_p11, %p1311_p10 }
  0x3d   :  { %1319 = shalt.err (!%p1316_p12)
}
  0x3e   :  { %s1320_s0 = scalar_lea.vmem %s53_s16, 2048  ;;  %p1325_p0 = scmp.lt.s32.totalorder %s53_s16, %s53_s16 }
  0x3f   :  { %p1321_p13 = scmp.ne.s32.totalorder %s53_s16, %s1320_s0  ;;  %p1326_p1 = scmp.lt.s32.totalorder %s1320_s0, %s1320_s0 }
  0x41   :  { %p1327_p2 = por %p1326_p1, %p1325_p0 }
  0x43   :  { %p1328_p3 = pnand %p1327_p2, %p1321_p13 }
  0x45   :  { %1331 = shalt.err (!%p1328_p3)
}
  0x46   :  { %58 = dma.hbm_to_vmem [thread:$0]  %s1611_s3, 2048, %s53_s16, [#allocation6], %s1413_s5, %s1413_s5, %s1414_s28  }
  0x47   :  { %s1332_s11 = scalar_lea.hbm %s1615_s7, 1024 }
  0x48   :  { %p1333_p4 = scmp.ne.s32.totalorder %s1615_s7, %s1332_s11  ;;  %p1336_p5 = scmp.lt.u32.totalorder %s1332_s11, %s1615_s7 }
  0x4a   :  { %p1338_p6 = pnand %p1336_p5, %p1333_p4 }
  0x4c   :  { %1341 = shalt.err (!%p1338_p6)
}
  0x4d   :  { %s1342_s1 = scalar_lea.vmem %s81_s18, 1024  ;;  %p1347_p8 = scmp.lt.s32.totalorder %s81_s18, %s81_s18 }
  0x4e   :  { %p1343_p7 = scmp.ne.s32.totalorder %s81_s18, %s1342_s1  ;;  %p1348_p9 = scmp.lt.s32.totalorder %s1342_s1, %s1342_s1 }
  0x50   :  { %p1349_p10 = por %p1348_p9, %p1347_p8 }
  0x52   :  { %p1350_p11 = pnand %p1349_p10, %p1343_p7 }
  0x54   :  { %1353 = shalt.err (!%p1350_p11)
}
  0x55   :  { %86 = dma.hbm_to_vmem [thread:$0]  %s1615_s7, 1024, %s81_s18, [#allocation9], %s1409_s23, %s1409_s23, %s1410_s24  }
  0x56   :  { %1398 = dma.done.wait [#allocation3], 768  }
  0x57   :  { %1399 = vsyncadd [#allocation3], 4294966528 }
  0x58   :  { %1400 = dma.done.wait [#allocation6], 4096  }
  0x59   :  { %1401 = vsyncadd [#allocation6], 4294963200 }
  0x5a   :  { %1402 = dma.done.wait [#allocation9], 3072  }
  0x5b   :  { %1403 = vsyncadd [#allocation9], 4294964224  ;;  %v1147_v0 = vld [vmem:[#allocation5 + $0x40] sm:$0xff]   ;;  %v1149_v2 = vld [vmem:[#allocation5 + $0x48] sm:$0xff]   ;;  %v1417_v38 = vmov 0   ;;  %vm1419_vm0 = vmmov 0  }
  0x5c   :  { %v1148_v1 = vld [vmem:[#allocation5] sm:$0xff]   ;;  %1026 = vmatprep.subr.bf16.mxu0 %v1147_v0  ;;  %v1150_v3 = vld [vmem:[#allocation5 + $0x8] sm:$0xff]   ;;  %v1151_v4 = vld [vmem:[#allocation5 + $0x50] sm:$0xff]   ;;  %488 = vmatprep.mubr.bf16.mxu1 %v1417_v38 }
  0x5d   :  { %1027 = vmatpush3.bf16.msra.mxu0 %v1148_v1  ;;  %v1152_v5 = vld [vmem:[#allocation5 + $0x10] sm:$0xff]   ;;  %v1153_v6 = vld [vmem:[#allocation5 + $0x58] sm:$0xff]   ;;  %v1155_v8 = vld [vmem:[#allocation5 + $0x60] sm:$0xff]  }
  0x5e   :  { %1028 = vmatprep.subr.bf16.mxu0 %v1149_v2  ;;  %v1154_v7 = vld [vmem:[#allocation5 + $0x18] sm:$0xff]   ;;  %v1156_v9 = vld [vmem:[#allocation5 + $0x20] sm:$0xff]   ;;  %v1157_v10 = vld [vmem:[#allocation5 + $0x68] sm:$0xff]  }
  0x5f   :  { %v1165_v11 = vld [vmem:[#allocation2 + $0x4] ss:$8 sps:$4 sm:$0xff]   ;;  %v1158_v12 = vld [vmem:[#allocation5 + $0x28] sm:$0xff]   ;;  %v1177_v19 = vld [vmem:[#allocation7 + $0x10] ss:$8 sps:$4 sm:$0xff]  }
  0x60   :  { %v1159_v13 = vld [vmem:[#allocation5 + $0x70] sm:$0xff]   ;;  %308 = vmatprep.mubr.bf16.mxu0 %v1165_v11  ;;  %v1172_v14 = vld [vmem:[#allocation7 + $0x4] ss:$8 sps:$4 sm:$0xff]   ;;  %v1174_v15 = vld [vmem:[#allocation7] ss:$8 sps:$4 sm:$0xff]  }
  0x61   :  { %1029 = vmatpush3.bf16.msra.mxu0 %v1150_v3  ;;  %v1160_v16 = vld [vmem:[#allocation5 + $0x30] sm:$0xff]   ;;  %456 = vmatprep.subr.bf16.mxu1 %v1172_v14  ;;  %v1161_v18 = vld [vmem:[#allocation5 + $0x78] sm:$0xff]   ;;  %v1178_v20 = vld [vmem:[#allocation7 + $0x24] ss:$8 sps:$4 sm:$0xff]  }
  0x62   :  { %1030 = vmatprep.subr.bf16.mxu0 %v1151_v4  ;;  %v1175_v17 = vld [vmem:[#allocation7 + $0x14] ss:$8 sps:$4 sm:$0xff]   ;;  %457 = vmatpush1.bf16.msra.mxu1 %v1174_v15  ;;  %v1180_v22 = vld [vmem:[#allocation7 + $0x20] ss:$8 sps:$4 sm:$0xff]   ;;  %v1163_v24 = vld [vmem:[#allocation2] ss:$8 sps:$4 sm:$0xff]  }
  0x63   :  { %458 = vmatprep.subr.bf16.mxu1 %v1175_v17  ;;  %v1162_v21 = vld [vmem:[#allocation5 + $0x38] sm:$0xff]   ;;  %v1166_v25 = vld [vmem:[#allocation2 + $0x14] ss:$8 sps:$4 sm:$0xff]   ;;  %v1186_v28 = vld [vmem:[#allocation7 + $0x40] ss:$8 sps:$4 sm:$0xff]  }
  0x64   :  { %v1181_v23 = vld [vmem:[#allocation7 + $0x34] ss:$8 sps:$4 sm:$0xff]   ;;  %v1183_v26 = vld [vmem:[#allocation7 + $0x30] ss:$8 sps:$4 sm:$0xff]   ;;  %v1184_v27 = vld [vmem:[#allocation7 + $0x44] ss:$8 sps:$4 sm:$0xff]  }
  0x65   :  { %1031 = vmatpush3.bf16.msra.mxu0 %v1152_v5  ;;  %v1168_v29 = vld [vmem:[#allocation2 + $0x10] ss:$8 sps:$4 sm:$0xff]   ;;  %v1169_v30 = vld [vmem:[#allocation2 + $0x24] ss:$8 sps:$4 sm:$0xff]   ;;  %v1171_v31 = vld [vmem:[#allocation2 + $0x20] ss:$8 sps:$4 sm:$0xff]  }
  0x66   :  { %1032 = vmatprep.subr.bf16.mxu0 %v1153_v6  ;;  %459 = vmatpush1.bf16.msra.mxu1 %v1177_v19  ;;  %v1187_v32 = vld [vmem:[#allocation7 + $0x54] ss:$8 sps:$4 sm:$0xff]   ;;  %v1189_v33 = vld [vmem:[#allocation7 + $0x50] ss:$8 sps:$4 sm:$0xff]   ;;  %v1190_v34 = vld [vmem:[#allocation7 + $0x64] ss:$8 sps:$4 sm:$0xff]  }
  0x67   :  { %460 = vmatprep.subr.bf16.mxu1 %v1178_v20  ;;  %v1192_v35 = vld [vmem:[#allocation7 + $0x60] ss:$8 sps:$4 sm:$0xff]   ;;  %v1193_v36 = vld [vmem:[#allocation7 + $0x74] ss:$8 sps:$4 sm:$0xff]   ;;  %v1195_v37 = vld [vmem:[#allocation7 + $0x70] ss:$8 sps:$4 sm:$0xff]  }
  0x68   :  { %v1196_v39 = vld [vmem:[#allocation8 + $0x40] sm:$0xff]   ;;  %v1198_v41 = vld [vmem:[#allocation8 + $0x48] sm:$0xff]   ;;  %v1200_v43 = vld [vmem:[#allocation8 + $0x50] sm:$0xff]  }
  0x69   :  { %1033 = vmatpush3.bf16.msra.mxu0 %v1154_v7  ;;  %v1197_v40 = vld [vmem:[#allocation8] sm:$0xff]   ;;  %v1199_v42 = vld [vmem:[#allocation8 + $0x8] sm:$0xff]   ;;  %v1201_v44 = vld [vmem:[#allocation8 + $0x10] sm:$0xff]  }
  0x6a   :  { %1034 = vmatprep.subr.bf16.mxu0 %v1155_v8  ;;  %461 = vmatpush1.bf16.msra.mxu1 %v1180_v22  ;;  %v1202_v45 = vld [vmem:[#allocation8 + $0x58] sm:$0xff]   ;;  %v1204_v47 = vld [vmem:[#allocation8 + $0x60] sm:$0xff]   ;;  %v955_v50 = vld [vmem:[%s1610_s2] ss:$0 sm:$0xff] }
  0x6b   :  { %462 = vmatprep.subr.bf16.mxu1 %v1181_v23  ;;  %v1203_v46 = vld [vmem:[#allocation8 + $0x18] sm:$0xff]   ;;  %v1205_v48 = vld [vmem:[#allocation8 + $0x20] sm:$0xff]  }
  0x6d   :  { %1035 = vmatpush3.bf16.msra.mxu0 %v1156_v9 }
  0x6e   :  { %1036 = vmatprep.subr.bf16.mxu0 %v1157_v10  ;;  %463 = vmatpush1.bf16.msra.mxu1 %v1183_v26  ;;  %v1207_v26 = vld [vmem:[#allocation8 + $0x28] sm:$0xff]  }
  0x6f   :  { %464 = vmatprep.subr.bf16.mxu1 %v1184_v27  ;;  %v1208_v27 = vld [vmem:[#allocation8 + $0x70] sm:$0xff]  }
  0x71   :  { %1037 = vmatpush3.bf16.msra.mxu0 %v1158_v12 }
  0x72   :  { %1038 = vmatprep.subr.bf16.mxu0 %v1159_v13  ;;  %465 = vmatpush1.bf16.msra.mxu1 %v1186_v28  ;;  %v1209_v28 = vld [vmem:[#allocation8 + $0x30] sm:$0xff]  }
  0x73   :  { %466 = vmatprep.subr.bf16.mxu1 %v1187_v32 }
  0x75   :  { %1039 = vmatpush3.bf16.msra.mxu0 %v1160_v16 }
  0x76   :  { %1040 = vmatprep.subr.bf16.mxu0 %v1161_v18  ;;  %467 = vmatpush1.bf16.msra.mxu1 %v1189_v33 }
  0x77   :  { %468 = vmatprep.subr.bf16.mxu1 %v1190_v34  ;;  %v364_v34 = vld [vmem:[%s1612_s4] sm:$0x3] }
  0x79   :  { %1041 = vmatpush3.bf16.msra.mxu0 %v1162_v21 }
  0x7a   :  { %469 = vmatpush1.bf16.msra.mxu1 %v1192_v35  ;;  %1060 = vmatprep.subr.bf16.mxu0 %v1196_v39 }
  0x7b   :  { %470 = vmatprep.subr.bf16.mxu1 %v1193_v36 }
  0x7c   :  { %309 = vmatmul.mubr.bf16.vlgmr.msra.gmra.mrb[0].mxu0 %v1163_v24 }
  0x7d   :  { %316 = vmatprep.mubr.bf16.mxu0 %v1166_v25  ;;  %1061 = vmatpush3.bf16.msra.mxu0 %v1197_v40  ;;  %v1206_v25 = vld [vmem:[#allocation8 + $0x68] sm:$0xff]  }
  0x7e   :  { %471 = vmatpush1.bf16.msra.mxu1 %v1195_v37  ;;  %1062 = vmatprep.subr.bf16.mxu0 %v1198_v41 }
  0x81   :  { %1063 = vmatpush3.bf16.msra.mxu0 %v1199_v42 }
  0x82   :  { %1064 = vmatprep.subr.bf16.mxu0 %v1200_v43 }
  0x84   :  { %317 = vmatmul.mubr.bf16.gmra.mrb[4].mxu0 %v1168_v29  ;;  %v1210_v29 = vld [vmem:[#allocation8 + $0x78] sm:$0xff]  }
  0x85   :  { %324 = vmatprep.mubr.bf16.mxu0 %v1169_v30  ;;  %1065 = vmatpush3.bf16.msra.mxu0 %v1201_v44  ;;  %v1211_v30 = vld [vmem:[#allocation8 + $0x38] sm:$0xff]  }
  0x86   :  { %1066 = vmatprep.subr.bf16.mxu0 %v1202_v45 }
  0x89   :  { %1067 = vmatpush3.bf16.msra.mxu0 %v1203_v46 }
  0x8a   :  { %1068 = vmatprep.subr.bf16.mxu0 %v1204_v47 }
  0x8c   :  { %325 = vmatmul.mubr.bf16.gmra.mrb[8].mxu0 %v1171_v31  ;;  %v366_v31 = vlaneseq }
  0x8d   :  { %1069 = vmatpush3.bf16.msra.mxu0 %v1205_v48 }
  0x8e   :  { %1070 = vmatprep.subr.bf16.mxu0 %v1206_v25  ;;  %v367_v32 = vshrl.u32 %v366_v31, 7  ;;  %v1214_v31 = vld [vmem:[#allocation10 + $0x10] sm:$0xff]  }
  0x90   :  { %v368_v33 = vsub.s32 0, %v367_v32  ;;  %v372_v35 = vsub.s32 1, %v367_v32  ;;  %v1215_v32 = vld [vmem:[#allocation10 + $0x18] sm:$0xff]  }
  0x91   :  { %1071 = vmatpush3.bf16.msra.mxu0 %v1207_v26 }
  0x92   :  { %1072 = vmatprep.subr.bf16.mxu0 %v1208_v27  ;;  %v369_v36 = vrot.slane %v364_v34, %v368_v33  ;;  %v373_v37 = vrot.slane %v364_v34, %v372_v35  ;;  %v1216_v33 = vld [vmem:[#allocation10 + $0x20] sm:$0xff]   ;;  %v1217_v34 = vld [vmem:[#allocation10 + $0x28] sm:$0xff]   ;;  %v1218_v35 = vld [vmem:[#allocation10 + $0x30] sm:$0xff]  }
  0x95   :  { %1073 = vmatpush3.bf16.msra.mxu0 %v1209_v28  ;;  %v1212_v28 = vld [vmem:[#allocation10] sm:$0xff]  }
  0x96   :  { %1074 = vmatprep.subr.bf16.mxu0 %v1210_v29  ;;  %v1418_v29 = vmov 0.0  }
  0x97   :  { %1105 = vmatprep.subr.bf16.mxu1 %v1418_v29 }
  0x99   :  { %1075 = vmatpush3.bf16.msra.mxu0 %v1211_v30  ;;  %v1213_v30 = vld [vmem:[#allocation10 + $0x8] sm:$0xff]  }
 0x14f   :  { %v1042_v49 = vpop.f32.mrb[0].mxu0 }
 0x150   :  { %v1043_v51 = vpop.f32.mrb[1].mxu0 }
 0x151   :  { %v1044_v52 = vadd.f32 %v1043_v51, %v1042_v49  ;;  %v1045_v53 = vpop.f32.mrb[2].mxu0 }
 0x152   :  { %v1046_v54 = vpop.f32.mrb[3].mxu0 }
 0x153   :  { %v311_v55 = vadd.f32 %v1044_v52, %v955_v50  ;;  %v1047_v56 = vadd.f32 %v1046_v54, %v1045_v53 }
 0x155   :  { %v333_v57 = vmul.f32 0.01, %v311_v55  ;;  %v314_v58 = vadd.f32 %v1047_v56, %v955_v50 }
 0x157   :  { %v334_v59 = vmul.f32 0.01, %v314_v58  ;;  %v1048_v60 = vpop.f32.mrb[4].mxu0  ;;  %v339_v62 = vmax.f32 %v311_v55, %v333_v57 }
 0x158   :  { %v1049_v61 = vpop.f32.mrb[5].mxu0 }
 0x159   :  { %v340_v63 = vmax.f32 %v314_v58, %v334_v59  ;;  %v1050_v0 = vadd.f32 %v1049_v61, %v1048_v60  ;;  %v1051_v1 = vpop.f32.mrb[6].mxu0 }
 0x15a   :  { %v1052_v2 = vpop.f32.mrb[7].mxu0 }
 0x15b   :  { %v319_v3 = vadd.f32 %v1050_v0, %v955_v50  ;;  %v1053_v4 = vadd.f32 %v1052_v2, %v1051_v1  ;;  %v345_v5 = vpack.c.bf16 %v340_v63, %v339_v62 }
 0x15d   :  { %v335_v6 = vmul.f32 0.01, %v319_v3  ;;  %v322_v7 = vadd.f32 %v1053_v4, %v955_v50  ;;  %489 = vmatmul.mubr.bf16.vlgmr.msra.gmra.mrb[0].mxu1 %v345_v5 }
 0x15e   :  { %498 = vmatprep.mubr.bf16.mxu1 %v1417_v38  ;;  %1106 = vmatpush3.bf16.msra.mxu1 %v1212_v28 }
 0x15f   :  { %v336_v8 = vmul.f32 0.01, %v322_v7  ;;  %v1054_v9 = vpop.f32.mrb[8].mxu0  ;;  %v341_v11 = vmax.f32 %v319_v3, %v335_v6  ;;  %1107 = vmatprep.subr.bf16.mxu1 %v1418_v29 }
 0x160   :  { %v1055_v10 = vpop.f32.mrb[9].mxu0 }
 0x161   :  { %v342_v12 = vmax.f32 %v322_v7, %v336_v8  ;;  %v1056_v13 = vadd.f32 %v1055_v10, %v1054_v9  ;;  %v1057_v14 = vpop.f32.mrb[10].mxu0 }
 0x162   :  { %v1058_v15 = vpop.f32.mrb[11].mxu0  ;;  %1108 = vmatpush3.bf16.msra.mxu1 %v1213_v30 }
 0x163   :  { %v327_v16 = vadd.f32 %v1056_v13, %v955_v50  ;;  %v1059_v17 = vadd.f32 %v1058_v15, %v1057_v14  ;;  %v346_v18 = vpack.c.bf16 %v342_v12, %v341_v11  ;;  %1109 = vmatprep.subr.bf16.mxu1 %v1418_v29 }
 0x165   :  { %v337_v19 = vmul.f32 0.01, %v327_v16  ;;  %v330_v20 = vadd.f32 %v1059_v17, %v955_v50  ;;  %499 = vmatmul.mubr.bf16.gmra.mrb[4].mxu1 %v346_v18 }
 0x166   :  { %508 = vmatprep.mubr.bf16.mxu1 %v1417_v38  ;;  %1110 = vmatpush3.bf16.msra.mxu1 %v1214_v31 }
 0x167   :  { %v338_v21 = vmul.f32 0.01, %v330_v20  ;;  %v343_v22 = vmax.f32 %v327_v16, %v337_v19  ;;  %1111 = vmatprep.subr.bf16.mxu1 %v1418_v29 }
 0x169   :  { %v344_v23 = vmax.f32 %v330_v20, %v338_v21 }
 0x16a   :  { %1112 = vmatpush3.bf16.msra.mxu1 %v1215_v32 }
 0x16b   :  { %v347_v24 = vpack.c.bf16 %v344_v23, %v343_v22  ;;  %1113 = vmatprep.subr.bf16.mxu1 %v1418_v29 }
 0x16d   :  { %509 = vmatmul.mubr.bf16.gmra.mrb[8].mxu1 %v347_v24 }
 0x16e   :  { %1114 = vmatpush3.bf16.msra.mxu1 %v1216_v33  ;;  %1121 = vmatprep.mubr.msk.bf16.mxu1 %vm1419_vm0, %v1418_v29 }
 0x16f   :  { %1115 = vmatprep.subr.bf16.mxu1 %v1418_v29 }
 0x172   :  { %1116 = vmatpush3.bf16.msra.mxu1 %v1217_v34 }
 0x173   :  { %1117 = vmatprep.subr.bf16.mxu1 %v1418_v29 }
 0x176   :  { %1118 = vmatpush3.bf16.msra.mxu1 %v1218_v35 }
 0x177   :  { %1119 = vmatprep.subr.bf16.mxu1 %v1418_v29 }
 0x230   :  { %v490_v38 = vpop.f32.mrb[0].mxu1 }
 0x231   :  { %v491_v39 = vadd.f32 %v490_v38, %v369_v36  ;;  %v492_v40 = vpop.f32.mrb[1].mxu1  ;;  %v994_v38 = vld [vmem:[%s1614_s6] ss:$0 sm:$0xff]  ;;  %s1420_s6 = smov [#allocation12]  }
 0x232   :  { %v493_v41 = vadd.f32 %v492_v40, %v373_v37  ;;  %v494_v42 = vpop.f32.mrb[2].mxu1  ;;  %s937_s14 = sshll.u32 %s1420_s6, 4  ;;  %s938_s14 = int_to_ptr.vmem [resolvable:$true] %s937_s14 }
 0x233   :  { %v519_v43 = vmul.f32 0.01, %v491_v39  ;;  %v495_v44 = vadd.f32 %v494_v42, %v369_v36  ;;  %v496_v45 = vpop.f32.mrb[3].mxu1  ;;  %s1354_s19 = scalar_lea.vmem %s938_s14, 768  ;;  %p1359_p13 = scmp.lt.s32.totalorder %s938_s14, %s938_s14 }
 0x234   :  { %v520_v46 = vmul.f32 0.01, %v493_v41  ;;  %v497_v47 = vadd.f32 %v496_v45, %v373_v37  ;;  %p1355_p12 = scmp.ne.s32.totalorder %s938_s14, %s1354_s19  ;;  %p1360_p0 = scmp.lt.s32.totalorder %s1354_s19, %s1354_s19 }
 0x235   :  { %v521_v48 = vmul.f32 0.01, %v495_v44  ;;  %v531_v50 = vmax.f32 %v491_v39, %v519_v43 }
 0x236   :  { %v522_v49 = vmul.f32 0.01, %v497_v47  ;;  %v532_v52 = vmax.f32 %v493_v41, %v520_v46  ;;  %p1361_p1 = por %p1360_p0, %p1359_p13 }
 0x237   :  { %v533_v51 = vmax.f32 %v495_v44, %v521_v48 }
 0x238   :  { %v534_v53 = vmax.f32 %v497_v47, %v522_v49  ;;  %v500_v54 = vpop.f32.mrb[4].mxu1  ;;  %p1362_p2 = pnand %p1361_p1, %p1355_p12 }
 0x239   :  { %v543_v55 = vpack.c.bf16 %v533_v51, %v531_v50  ;;  %v501_v56 = vadd.f32 %v500_v54, %v369_v36  ;;  %v502_v57 = vpop.f32.mrb[5].mxu1 }
 0x23a   :  { %v503_v58 = vadd.f32 %v502_v57, %v373_v37  ;;  %v504_v59 = vpop.f32.mrb[6].mxu1  ;;  %v544_v60 = vpack.c.bf16 %v534_v53, %v532_v52 }
 0x23b   :  { %v523_v61 = vmul.f32 0.01, %v501_v56  ;;  %v505_v62 = vadd.f32 %v504_v59, %v369_v36  ;;  %v506_v63 = vpop.f32.mrb[7].mxu1 }
 0x23c   :  { %v524_v0 = vmul.f32 0.01, %v503_v58  ;;  %v507_v1 = vadd.f32 %v506_v63, %v373_v37  ;;  %716 = vmatprep.mubr.bf16.mxu0 %v544_v60 }
 0x23d   :  { %v525_v2 = vmul.f32 0.01, %v505_v62  ;;  %717 = vmatmul.mubr.bf16.vlgmr.msra.gmra.mrb[12].mxu0 %v543_v55  ;;  %v535_v4 = vmax.f32 %v501_v56, %v523_v61 }
 0x23e   :  { %v526_v3 = vmul.f32 0.01, %v507_v1  ;;  %v536_v6 = vmax.f32 %v503_v58, %v524_v0 }
 0x23f   :  { %v537_v5 = vmax.f32 %v505_v62, %v525_v2 }
 0x240   :  { %v538_v7 = vmax.f32 %v507_v1, %v526_v3  ;;  %v510_v8 = vpop.f32.mrb[8].mxu1 }
 0x241   :  { %v511_v9 = vadd.f32 %v510_v8, %v369_v36  ;;  %v512_v10 = vpop.f32.mrb[9].mxu1  ;;  %v545_v11 = vpack.c.bf16 %v537_v5, %v535_v4 }
 0x242   :  { %v513_v12 = vadd.f32 %v512_v10, %v373_v37  ;;  %v514_v13 = vpop.f32.mrb[10].mxu1  ;;  %v546_v14 = vpack.c.bf16 %v538_v7, %v536_v6 }
 0x243   :  { %v527_v15 = vmul.f32 0.01, %v511_v9  ;;  %v515_v16 = vadd.f32 %v514_v13, %v369_v36  ;;  %v516_v17 = vpop.f32.mrb[11].mxu1  ;;  %v1219_v36 = vld [vmem:[#allocation10 + $0x38] sm:$0xff]  }
 0x244   :  { %v528_v18 = vmul.f32 0.01, %v513_v12  ;;  %v517_v19 = vadd.f32 %v516_v17, %v373_v37  ;;  %724 = vmatprep.mubr.bf16.mxu0 %v546_v14  ;;  %1120 = vmatpush3.bf16.msra.mxu1 %v1219_v36 }
 0x245   :  { %v529_v20 = vmul.f32 0.01, %v515_v16  ;;  %725 = vmatmul.mubr.bf16.gmra.mrb[16].mxu0 %v545_v11  ;;  %v539_v22 = vmax.f32 %v511_v9, %v527_v15 }
 0x246   :  { %v530_v21 = vmul.f32 0.01, %v517_v19  ;;  %v540_v24 = vmax.f32 %v513_v12, %v528_v18 }
 0x247   :  { %v541_v23 = vmax.f32 %v515_v16, %v529_v20 }
 0x248   :  { %v542_v25 = vmax.f32 %v517_v19, %v530_v21 }
 0x249   :  { %v547_v26 = vpack.c.bf16 %v541_v23, %v539_v22 }
 0x24a   :  { %v548_v27 = vpack.c.bf16 %v542_v25, %v540_v24 }
 0x24c   :  { %732 = vmatprep.mubr.bf16.mxu0 %v548_v27 }
 0x24d   :  { %733 = vmatmul.mubr.bf16.gmra.mrb[20].mxu0 %v547_v26 }
 0x310   :  { %v1076_v37 = vpop.f32.mrb[12].mxu0 }
 0x311   :  { %v1077_v39 = vpop.f32.mrb[13].mxu0 }
 0x312   :  { %v1078_v40 = vadd.f32 %v1077_v39, %v1076_v37  ;;  %v1079_v41 = vpop.f32.mrb[14].mxu0 }
 0x313   :  { %v1080_v42 = vpop.f32.mrb[15].mxu0 }
 0x314   :  { %v719_v43 = vadd.f32 %v1078_v40, %v994_v38  ;;  %v1081_v44 = vadd.f32 %v1080_v42, %v1079_v41 }
 0x316   :  { %v1011_v45 = vmul.f32 -1.442695, %v719_v43  ;;  %v722_v46 = vadd.f32 %v1081_v44, %v994_v38 }
 0x318   :  { %1220 = vpow2.f32 %v1011_v45  ;;  %v1012_v47 = vmul.f32 -1.442695, %v722_v46  ;;  %v1082_v48 = vpop.f32.mrb[16].mxu0 }
 0x319   :  { %v1083_v49 = vpop.f32.mrb[17].mxu0 }
 0x31a   :  { %1222 = vpow2.f32 %v1012_v47  ;;  %v1084_v50 = vadd.f32 %v1083_v49, %v1082_v48  ;;  %v1085_v51 = vpop.f32.mrb[18].mxu0 }
 0x31b   :  { %v1086_v52 = vpop.f32.mrb[19].mxu0 }
 0x31c   :  { %v727_v53 = vadd.f32 %v1084_v50, %v994_v38  ;;  %v1087_v54 = vadd.f32 %v1086_v52, %v1085_v51 }
 0x31e   :  { %v1013_v55 = vmul.f32 -1.442695, %v727_v53  ;;  %v730_v56 = vadd.f32 %v1087_v54, %v994_v38 }
 0x320   :  { %1224 = vpow2.f32 %v1013_v55  ;;  %v1014_v57 = vmul.f32 -1.442695, %v730_v56  ;;  %v1088_v58 = vpop.f32.mrb[20].mxu0 }
 0x321   :  { %v1089_v59 = vpop.f32.mrb[21].mxu0 }
 0x322   :  { %v1221_v60 = vpop.eup %1220  ;;  %1226 = vpow2.f32 %v1014_v57  ;;  %v1090_v61 = vadd.f32 %v1089_v59, %v1088_v58  ;;  %v1091_v62 = vpop.f32.mrb[22].mxu0 }
 0x323   :  { %v759_v63 = vadd.f32 1.0, %v1221_v60  ;;  %v1092_v0 = vpop.f32.mrb[23].mxu0 }
 0x324   :  { %v1223_v1 = vpop.eup %1222  ;;  %v735_v2 = vadd.f32 %v1090_v61, %v994_v38  ;;  %v1093_v3 = vadd.f32 %v1092_v0, %v1091_v62 }
 0x325   :  { %1228 = vrcp.f32 %v759_v63  ;;  %v760_v4 = vadd.f32 1.0, %v1223_v1 }
 0x326   :  { %v1015_v5 = vmul.f32 -1.442695, %v735_v2  ;;  %v738_v6 = vadd.f32 %v1093_v3, %v994_v38 }
 0x327   :  { %1230 = vrcp.f32 %v760_v4 }
 0x328   :  { %1232 = vpow2.f32 %v1015_v5  ;;  %v1016_v7 = vmul.f32 -1.442695, %v738_v6 }
 0x32a   :  { %v1225_v8 = vpop.eup %1224  ;;  %1234 = vpow2.f32 %v1016_v7 }
 0x32b   :  { %v761_v9 = vadd.f32 1.0, %v1225_v8 }
 0x32c   :  { %v1227_v10 = vpop.eup %1226 }
 0x32d   :  { %1236 = vrcp.f32 %v761_v9  ;;  %v762_v11 = vadd.f32 1.0, %v1227_v10 }
 0x32f   :  { %v1229_v12 = vpop.eup %1228  ;;  %1238 = vrcp.f32 %v762_v11 }
 0x330   :  { %908 = vst [vmem:[#allocation12] sm:$0xff] %v1229_v12 }
 0x331   :  { %v1231_v13 = vpop.eup %1230 }
 0x332   :  { %v1233_v14 = vpop.eup %1232  ;;  %909 = vst [vmem:[#allocation12 + $0x8] sm:$0xff] %v1231_v13  ;;  %v777_v15 = vpack.c.bf16 %v1231_v13, %v1229_v12 }
 0x333   :  { %v763_v16 = vadd.f32 1.0, %v1233_v14 }
 0x334   :  { %v1235_v17 = vpop.eup %1234  ;;  %1122 = vmatmul.mubr.bf16.vlgmr.msra.gmra.mrb[12].mxu1 %v777_v15 }
 0x335   :  { %1240 = vrcp.f32 %v763_v16  ;;  %v764_v18 = vadd.f32 1.0, %v1235_v17  ;;  %1125 = vmatprep.mubr.msk.bf16.mxu1 %vm1419_vm0, %v1418_v29 }
 0x337   :  { %v1237_v19 = vpop.eup %1236  ;;  %1242 = vrcp.f32 %v764_v18 }
 0x338   :  { %910 = vst [vmem:[#allocation12 + $0x10] sm:$0xff] %v1237_v19 }
 0x339   :  { %v1239_v20 = vpop.eup %1238 }
 0x33a   :  { %911 = vst [vmem:[#allocation12 + $0x18] sm:$0xff] %v1239_v20  ;;  %v778_v21 = vpack.c.bf16 %v1239_v20, %v1237_v19 }
 0x33c   :  { %1126 = vmatmul.mubr.bf16.gmra.mrb[16].mxu1 %v778_v21 }
 0x33d   :  { %1129 = vmatprep.mubr.msk.bf16.mxu1 %vm1419_vm0, %v1418_v29 }
 0x33f   :  { %v1241_v22 = vpop.eup %1240 }
 0x340   :  { %912 = vst [vmem:[#allocation12 + $0x20] sm:$0xff] %v1241_v22 }
 0x341   :  { %v1243_v23 = vpop.eup %1242 }
 0x342   :  { %913 = vst [vmem:[#allocation12 + $0x28] sm:$0xff] %v1243_v23  ;;  %v779_v24 = vpack.c.bf16 %v1243_v23, %v1241_v22 }
 0x344   :  { %1130 = vmatmul.mubr.bf16.gmra.mrb[20].mxu1 %v779_v24 }
 0x345   :  { %1365 = shalt.err (!%p1362_p2)
}
 0x346   :  { %s1366_s22 = scalar_lea.hbm %s1618_s10, 768 }
 0x347   :  { %p1367_p3 = scmp.ne.s32.totalorder %s1618_s10, %s1366_s22  ;;  %p1370_p4 = scmp.lt.u32.totalorder %s1366_s22, %s1618_s10 }
 0x349   :  { %p1372_p5 = pnand %p1370_p4, %p1367_p3 }
 0x34b   :  { %1375 = shalt.err (!%p1372_p5)
}
 0x34c   :  { %943 = dma.vmem_to_hbm [thread:$0]  %s938_s14, 768, %s1618_s10, [#allocation13], %s1413_s5, %s1413_s5, %s1414_s28  }
 0x34d   :  { %v1017_v25 = vld [vmem:[%s1616_s8] ss:$0 sm:$0xff]  ;;  %s1421_s10 = smov [#allocation11]  }
 0x34e   :  { %s925_s13 = sshll.u32 %s1421_s10, 4  ;;  %s926_s13 = int_to_ptr.vmem [resolvable:$true] %s925_s13 }
 0x34f   :  { %s1376_s8 = scalar_lea.vmem %s926_s13, 768  ;;  %p1381_p7 = scmp.lt.s32.totalorder %s926_s13, %s926_s13 }
 0x350   :  { %p1377_p6 = scmp.ne.s32.totalorder %s926_s13, %s1376_s8  ;;  %p1382_p8 = scmp.lt.s32.totalorder %s1376_s8, %s1376_s8 }
 0x352   :  { %p1383_p9 = por %p1382_p8, %p1381_p7 }
 0x354   :  { %p1384_p10 = pnand %p1383_p9, %p1377_p6 }
 0x407   :  { %v885_v26 = vpop.f32.mrb[12].mxu1 }
 0x408   :  { %v886_v27 = vadd.f32 %v1017_v25, %v885_v26  ;;  %v1123_v28 = vpop.f32.mrb[13].mxu1 }
 0x409   :  { %v888_v29 = vpop.f32.mrb[14].mxu1 }
 0x40a   :  { %914 = vst [vmem:[#allocation11] sm:$0xff] %v886_v27  ;;  %v889_v30 = vadd.f32 %v1017_v25, %v888_v29  ;;  %v1124_v31 = vpop.f32.mrb[15].mxu1 }
 0x40c   :  { %915 = vst [vmem:[#allocation11 + $0x8] sm:$0xff] %v889_v30 }
 0x40f   :  { %v893_v32 = vpop.f32.mrb[16].mxu1 }
 0x410   :  { %v894_v33 = vadd.f32 %v1017_v25, %v893_v32  ;;  %v1127_v34 = vpop.f32.mrb[17].mxu1 }
 0x411   :  { %v896_v35 = vpop.f32.mrb[18].mxu1 }
 0x412   :  { %916 = vst [vmem:[#allocation11 + $0x10] sm:$0xff] %v894_v33  ;;  %v897_v36 = vadd.f32 %v1017_v25, %v896_v35  ;;  %v1128_v37 = vpop.f32.mrb[19].mxu1 }
 0x414   :  { %917 = vst [vmem:[#allocation11 + $0x18] sm:$0xff] %v897_v36 }
 0x417   :  { %v901_v38 = vpop.f32.mrb[20].mxu1 }
 0x418   :  { %v902_v39 = vadd.f32 %v1017_v25, %v901_v38  ;;  %v1131_v40 = vpop.f32.mrb[21].mxu1 }
 0x419   :  { %v904_v41 = vpop.f32.mrb[22].mxu1 }
 0x41a   :  { %918 = vst [vmem:[#allocation11 + $0x20] sm:$0xff] %v902_v39  ;;  %v905_v42 = vadd.f32 %v1017_v25, %v904_v41  ;;  %v1132_v43 = vpop.f32.mrb[23].mxu1 }
 0x41c   :  { %919 = vst [vmem:[#allocation11 + $0x28] sm:$0xff] %v905_v42 }
 0x41d   :  { %1387 = shalt.err (!%p1384_p10)
}
 0x41e   :  { %s1388_s1 = scalar_lea.hbm %s1617_s9, 768 }
 0x41f   :  { %p1389_p11 = scmp.ne.s32.totalorder %s1617_s9, %s1388_s1  ;;  %p1392_p12 = scmp.lt.u32.totalorder %s1388_s1, %s1617_s9 }
 0x421   :  { %p1394_p13 = pnand %p1392_p12, %p1389_p11 }
 0x423   :  { %1397 = shalt.err (!%p1394_p13)
}
 0x424   :  { %931 = dma.vmem_to_hbm [thread:$0]  %s926_s13, 768, %s1617_s9, [#allocation4], %s1413_s5, %s1413_s5, %s1414_s28  }
 0x425   :  { %1404 = dma.done.wait [#allocation4], 768  }
 0x426   :  { %1405 = vsyncadd [#allocation4], 4294966528 }
 0x427   :  { %1406 = dma.done.wait [#allocation13], 768  }
 0x428   :  { %1407 = vsyncadd [#allocation13], 4294966528 }
 0x429   :  { %950 = vsyncpa [#allocation3], 1 }
 0x42a   :  { %951 = vsyncpa [#allocation6], 1 }
 0x42b   :  { %952 = vsyncpa [#allocation9], 1 }
 0x42c   :  { %953 = vsyncpa [#allocation4], 1 }
 0x42d   :  { %954 = vsyncpa [#allocation13], 1 }

// kernel: tpu_custom_call.1
= control target key start
LH: loop header
LB: loop body
LE: loop exit
PB: predicated region body
PF: predicated region fallthrough
CT: control target
= control target key end

     0   :  { %16 = vsyncpa [#allocation3], 0  ;;  %s1608_s0 = inlined_call_operand.hbm [shape: bf16[48,256], index: 0, kind: input, shape index: {}]   ;;  %s1609_s1 = inlined_call_operand.hbm [shape: bf16[256,128], index: 1, kind: input, shape index: {}]   ;;  %s1610_s2 = inlined_call_operand.vmem [shape: f32[1,128], index: 2, kind: input, shape index: {}]   ;;  %s1611_s3 = inlined_call_operand.hbm [shape: bf16[128,256], index: 3, kind: input, shape index: {}]   ;;  %s1612_s4 = inlined_call_operand.vmem [shape: f32[1,256], index: 4, kind: input, shape index: {}]   ;;  %s1613_s5 = inlined_call_operand.hbm [shape: bf16[256,128], index: 5, kind: input, shape index: {}]   ;;  %s1614_s6 = inlined_call_operand.vmem [shape: f32[1,128], index: 6, kind: input, shape index: {}]   ;;  %s1615_s7 = inlined_call_operand.hbm [shape: bf16[128,128], index: 7, kind: input, shape index: {}]   ;;  %s1616_s8 = inlined_call_operand.vmem [shape: f32[1,128], index: 8, kind: input, shape index: {}]   ;;  %s1617_s9 = inlined_call_operand.hbm [shape: f32[48,128], index: 9, kind: output, shape index: {0}]   ;;  %s1618_s10 = inlined_call_operand.hbm [shape: f32[48,128], index: 10, kind: output, shape index: {1}]  }
   0x1   :  { %17 = vsyncpa [#allocation6], 0 }
   0x2   :  { %18 = vsyncpa [#allocation9], 0 }
   0x3   :  { %19 = vsyncpa [#allocation4], 0 }
   0x4   :  { %20 = vsyncpa [#allocation13], 0  ;;  %s1408_s13 = smov [#allocation5]   ;;  %s1244_s17 = scalar_lea.hbm %s1609_s1, 2048 }
   0x5   :  { %s38_s14 = sshll.u32 %s1408_s13, 4  ;;  %p1245_p0 = scmp.ne.s32.totalorder %s1609_s1, %s1244_s17  ;;  %s39_s14 = int_to_ptr.vmem [resolvable:$true] %s38_s14 }
   0x6   :  { %p1248_p1 = scmp.lt.u32.totalorder %s1244_s17, %s1609_s1 }
   0x8   :  { %p1250_p2 = pnand %p1248_p1, %p1245_p0 }
   0xa   :  { %1253 = shalt.err (!%p1250_p2)
}
   0xb   :  { %s1254_s22 = scalar_lea.vmem %s39_s14, 2048  ;;  %p1259_p4 = scmp.lt.s32.totalorder %s39_s14, %s39_s14 }
   0xc   :  { %p1255_p3 = scmp.ne.s32.totalorder %s39_s14, %s1254_s22  ;;  %p1260_p5 = scmp.lt.s32.totalorder %s1254_s22, %s1254_s22 }
   0xe   :  { %p1261_p6 = por %p1260_p5, %p1259_p4 }
  0x10   :  { %p1262_p7 = pnand %p1261_p6, %p1255_p3 }
  0x12   :  { %1265 = shalt.err (!%p1262_p7)
}
  0x13   :  { %s1409_s23 = smov 64   ;;  %s1410_s24 = smov 4  }
  0x14   :  { %44 = dma.hbm_to_vmem [thread:$0]  %s1609_s1, 2048, %s39_s14, [#allocation6], %s1409_s23, %s1409_s23, %s1410_s24  }
  0x15   :  { %s1411_s27 = smov [#allocation8]   ;;  %s1412_s29 = smov [#allocation2]  }
  0x16   :  { %s66_s28 = sshll.u32 %s1411_s27, 4  ;;  %s26_s30 = sshll.u32 %s1412_s29, 4  ;;  %s67_s28 = int_to_ptr.vmem [resolvable:$true] %s66_s28  ;;  %s27_s30 = int_to_ptr.vmem [resolvable:$true] %s26_s30 }
  0x17   :  { %s1266_s13 = scalar_lea.hbm %s1613_s5, 2048 }
  0x18   :  { %p1267_p8 = scmp.ne.s32.totalorder %s1613_s5, %s1266_s13  ;;  %p1270_p9 = scmp.lt.u32.totalorder %s1266_s13, %s1613_s5 }
  0x1a   :  { %p1272_p10 = pnand %p1270_p9, %p1267_p8 }
  0x1c   :  { %1275 = shalt.err (!%p1272_p10)
}
  0x1d   :  { %s1276_s1 = scalar_lea.vmem %s67_s28, 2048  ;;  %p1281_p12 = scmp.lt.s32.totalorder %s67_s28, %s67_s28 }
  0x1e   :  { %p1277_p11 = scmp.ne.s32.totalorder %s67_s28, %s1276_s1  ;;  %p1282_p13 = scmp.lt.s32.totalorder %s1276_s1, %s1276_s1 }
  0x20   :  { %p1283_p0 = por %p1282_p13, %p1281_p12 }
  0x22   :  { %p1284_p1 = pnand %p1283_p0, %p1277_p11 }
  0x24   :  { %1287 = shalt.err (!%p1284_p1)
}
  0x25   :  { %72 = dma.hbm_to_vmem [thread:$0]  %s1613_s5, 2048, %s67_s28, [#allocation9], %s1409_s23, %s1409_s23, %s1410_s24  }
  0x26   :  { %s1288_s22 = scalar_lea.hbm %s1608_s0, 768 }
  0x27   :  { %p1289_p2 = scmp.ne.s32.totalorder %s1608_s0, %s1288_s22  ;;  %p1292_p3 = scmp.lt.u32.totalorder %s1288_s22, %s1608_s0 }
  0x29   :  { %p1294_p4 = pnand %p1292_p3, %p1289_p2 }
  0x2b   :  { %1297 = shalt.err (!%p1294_p4)
}
  0x2c   :  { %s1298_s11 = scalar_lea.vmem %s27_s30, 768  ;;  %p1303_p6 = scmp.lt.s32.totalorder %s27_s30, %s27_s30 }
  0x2d   :  { %p1299_p5 = scmp.ne.s32.totalorder %s27_s30, %s1298_s11  ;;  %p1304_p7 = scmp.lt.s32.totalorder %s1298_s11, %s1298_s11 }
  0x2f   :  { %p1305_p8 = por %p1304_p7, %p1303_p6 }
  0x31   :  { %p1306_p9 = pnand %p1305_p8, %p1299_p5 }
  0x33   :  { %1309 = shalt.err (!%p1306_p9)
}
  0x34   :  { %s1413_s5 = smov 128   ;;  %s1414_s28 = smov 8  }
  0x35   :  { %32 = dma.hbm_to_vmem [thread:$0]  %s1608_s0, 768, %s27_s30, [#allocation3], %s1413_s5, %s1413_s5, %s1414_s28  }
  0x36   :  { %s1415_s15 = smov [#allocation7]   ;;  %s1416_s17 = smov [#allocation10]  }
  0x37   :  { %s52_s16 = sshll.u32 %s1415_s15, 4  ;;  %s80_s18 = sshll.u32 %s1416_s17, 4  ;;  %s53_s16 = int_to_ptr.vmem [resolvable:$true] %s52_s16  ;;  %s81_s18 = int_to_ptr.vmem [resolvable:$true] %s80_s18 }
  0x38   :  { %s1310_s19 = scalar_lea.hbm %s1611_s3, 2048 }
  0x39   :  { %p1311_p10 = scmp.ne.s32.totalorder %s1611_s3, %s1310_s19  ;;  %p1314_p11 = scmp.lt.u32.totalorder %s1310_s19, %s1611_s3 }
  0x3b   :  { %p1316_p12 = pnand %p1314_p11, %p1311_p10 }
  0x3d   :  { %1319 = shalt.err (!%p1316_p12)
}
  0x3e   :  { %s1320_s0 = scalar_lea.vmem %s53_s16, 2048  ;;  %p1325_p0 = scmp.lt.s32.totalorder %s53_s16, %s53_s16 }
  0x3f   :  { %p1321_p13 = scmp.ne.s32.totalorder %s53_s16, %s1320_s0  ;;  %p1326_p1 = scmp.lt.s32.totalorder %s1320_s0, %s1320_s0 }
  0x41   :  { %p1327_p2 = por %p1326_p1, %p1325_p0 }
  0x43   :  { %p1328_p3 = pnand %p1327_p2, %p1321_p13 }
  0x45   :  { %1331 = shalt.err (!%p1328_p3)
}
  0x46   :  { %58 = dma.hbm_to_vmem [thread:$0]  %s1611_s3, 2048, %s53_s16, [#allocation6], %s1413_s5, %s1413_s5, %s1414_s28  }
  0x47   :  { %s1332_s11 = scalar_lea.hbm %s1615_s7, 1024 }
  0x48   :  { %p1333_p4 = scmp.ne.s32.totalorder %s1615_s7, %s1332_s11  ;;  %p1336_p5 = scmp.lt.u32.totalorder %s1332_s11, %s1615_s7 }
  0x4a   :  { %p1338_p6 = pnand %p1336_p5, %p1333_p4 }
  0x4c   :  { %1341 = shalt.err (!%p1338_p6)
}
  0x4d   :  { %s1342_s1 = scalar_lea.vmem %s81_s18, 1024  ;;  %p1347_p8 = scmp.lt.s32.totalorder %s81_s18, %s81_s18 }
  0x4e   :  { %p1343_p7 = scmp.ne.s32.totalorder %s81_s18, %s1342_s1  ;;  %p1348_p9 = scmp.lt.s32.totalorder %s1342_s1, %s1342_s1 }
  0x50   :  { %p1349_p10 = por %p1348_p9, %p1347_p8 }
  0x52   :  { %p1350_p11 = pnand %p1349_p10, %p1343_p7 }
  0x54   :  { %1353 = shalt.err (!%p1350_p11)
}
  0x55   :  { %86 = dma.hbm_to_vmem [thread:$0]  %s1615_s7, 1024, %s81_s18, [#allocation9], %s1409_s23, %s1409_s23, %s1410_s24  }
  0x56   :  { %1398 = dma.done.wait [#allocation3], 768  }
  0x57   :  { %1399 = vsyncadd [#allocation3], 4294966528 }
  0x58   :  { %1400 = dma.done.wait [#allocation6], 4096  }
  0x59   :  { %1401 = vsyncadd [#allocation6], 4294963200 }
  0x5a   :  { %1402 = dma.done.wait [#allocation9], 3072  }
  0x5b   :  { %1403 = vsyncadd [#allocation9], 4294964224  ;;  %v1147_v0 = vld [vmem:[#allocation5 + $0x40] sm:$0xff]   ;;  %v1149_v2 = vld [vmem:[#allocation5 + $0x48] sm:$0xff]   ;;  %v1417_v38 = vmov 0   ;;  %vm1419_vm0 = vmmov 0  }
  0x5c   :  { %v1148_v1 = vld [vmem:[#allocation5] sm:$0xff]   ;;  %1026 = vmatprep.subr.bf16.mxu0 %v1147_v0  ;;  %v1150_v3 = vld [vmem:[#allocation5 + $0x8] sm:$0xff]   ;;  %v1151_v4 = vld [vmem:[#allocation5 + $0x50] sm:$0xff]   ;;  %488 = vmatprep.mubr.bf16.mxu1 %v1417_v38 }
  0x5d   :  { %1027 = vmatpush3.bf16.msra.mxu0 %v1148_v1  ;;  %v1152_v5 = vld [vmem:[#allocation5 + $0x10] sm:$0xff]   ;;  %v1153_v6 = vld [vmem:[#allocation5 + $0x58] sm:$0xff]   ;;  %v1155_v8 = vld [vmem:[#allocation5 + $0x60] sm:$0xff]  }
  0x5e   :  { %1028 = vmatprep.subr.bf16.mxu0 %v1149_v2  ;;  %v1154_v7 = vld [vmem:[#allocation5 + $0x18] sm:$0xff]   ;;  %v1156_v9 = vld [vmem:[#allocation5 + $0x20] sm:$0xff]   ;;  %v1157_v10 = vld [vmem:[#allocation5 + $0x68] sm:$0xff]  }
  0x5f   :  { %v1165_v11 = vld [vmem:[#allocation2 + $0x4] ss:$8 sps:$4 sm:$0xff]   ;;  %v1158_v12 = vld [vmem:[#allocation5 + $0x28] sm:$0xff]   ;;  %v1177_v19 = vld [vmem:[#allocation7 + $0x10] ss:$8 sps:$4 sm:$0xff]  }
  0x60   :  { %v1159_v13 = vld [vmem:[#allocation5 + $0x70] sm:$0xff]   ;;  %308 = vmatprep.mubr.bf16.mxu0 %v1165_v11  ;;  %v1172_v14 = vld [vmem:[#allocation7 + $0x4] ss:$8 sps:$4 sm:$0xff]   ;;  %v1174_v15 = vld [vmem:[#allocation7] ss:$8 sps:$4 sm:$0xff]  }
  0x61   :  { %1029 = vmatpush3.bf16.msra.mxu0 %v1150_v3  ;;  %v1160_v16 = vld [vmem:[#allocation5 + $0x30] sm:$0xff]   ;;  %456 = vmatprep.subr.bf16.mxu1 %v1172_v14  ;;  %v1161_v18 = vld [vmem:[#allocation5 + $0x78] sm:$0xff]   ;;  %v1178_v20 = vld [vmem:[#allocation7 + $0x24] ss:$8 sps:$4 sm:$0xff]  }
  0x62   :  { %1030 = vmatprep.subr.bf16.mxu0 %v1151_v4  ;;  %v1175_v17 = vld [vmem:[#allocation7 + $0x14] ss:$8 sps:$4 sm:$0xff]   ;;  %457 = vmatpush1.bf16.msra.mxu1 %v1174_v15  ;;  %v1180_v22 = vld [vmem:[#allocation7 + $0x20] ss:$8 sps:$4 sm:$0xff]   ;;  %v1163_v24 = vld [vmem:[#allocation2] ss:$8 sps:$4 sm:$0xff]  }
  0x63   :  { %458 = vmatprep.subr.bf16.mxu1 %v1175_v17  ;;  %v1162_v21 = vld [vmem:[#allocation5 + $0x38] sm:$0xff]   ;;  %v1166_v25 = vld [vmem:[#allocation2 + $0x14] ss:$8 sps:$4 sm:$0xff]   ;;  %v1186_v28 = vld [vmem:[#allocation7 + $0x40] ss:$8 sps:$4 sm:$0xff]  }
  0x64   :  { %v1181_v23 = vld [vmem:[#allocation7 + $0x34] ss:$8 sps:$4 sm:$0xff]   ;;  %v1183_v26 = vld [vmem:[#allocation7 + $0x30] ss:$8 sps:$4 sm:$0xff]   ;;  %v1184_v27 = vld [vmem:[#allocation7 + $0x44] ss:$8 sps:$4 sm:$0xff]  }
  0x65   :  { %1031 = vmatpush3.bf16.msra.mxu0 %v1152_v5  ;;  %v1168_v29 = vld [vmem:[#allocation2 + $0x10] ss:$8 sps:$4 sm:$0xff]   ;;  %v1169_v30 = vld [vmem:[#allocation2 + $0x24] ss:$8 sps:$4 sm:$0xff]   ;;  %v1171_v31 = vld [vmem:[#allocation2 + $0x20] ss:$8 sps:$4 sm:$0xff]  }
  0x66   :  { %1032 = vmatprep.subr.bf16.mxu0 %v1153_v6  ;;  %459 = vmatpush1.bf16.msra.mxu1 %v1177_v19  ;;  %v1187_v32 = vld [vmem:[#allocation7 + $0x54] ss:$8 sps:$4 sm:$0xff]   ;;  %v1189_v33 = vld [vmem:[#allocation7 + $0x50] ss:$8 sps:$4 sm:$0xff]   ;;  %v1190_v34 = vld [vmem:[#allocation7 + $0x64] ss:$8 sps:$4 sm:$0xff]  }
  0x67   :  { %460 = vmatprep.subr.bf16.mxu1 %v1178_v20  ;;  %v1192_v35 = vld [vmem:[#allocation7 + $0x60] ss:$8 sps:$4 sm:$0xff]   ;;  %v1193_v36 = vld [vmem:[#allocation7 + $0x74] ss:$8 sps:$4 sm:$0xff]   ;;  %v1195_v37 = vld [vmem:[#allocation7 + $0x70] ss:$8 sps:$4 sm:$0xff]  }
  0x68   :  { %v1196_v39 = vld [vmem:[#allocation8 + $0x40] sm:$0xff]   ;;  %v1198_v41 = vld [vmem:[#allocation8 + $0x48] sm:$0xff]   ;;  %v1200_v43 = vld [vmem:[#allocation8 + $0x50] sm:$0xff]  }
  0x69   :  { %1033 = vmatpush3.bf16.msra.mxu0 %v1154_v7  ;;  %v1197_v40 = vld [vmem:[#allocation8] sm:$0xff]   ;;  %v1199_v42 = vld [vmem:[#allocation8 + $0x8] sm:$0xff]   ;;  %v1201_v44 = vld [vmem:[#allocation8 + $0x10] sm:$0xff]  }
  0x6a   :  { %1034 = vmatprep.subr.bf16.mxu0 %v1155_v8  ;;  %461 = vmatpush1.bf16.msra.mxu1 %v1180_v22  ;;  %v1202_v45 = vld [vmem:[#allocation8 + $0x58] sm:$0xff]   ;;  %v1204_v47 = vld [vmem:[#allocation8 + $0x60] sm:$0xff]   ;;  %v955_v50 = vld [vmem:[%s1610_s2] ss:$0 sm:$0xff] }
  0x6b   :  { %462 = vmatprep.subr.bf16.mxu1 %v1181_v23  ;;  %v1203_v46 = vld [vmem:[#allocation8 + $0x18] sm:$0xff]   ;;  %v1205_v48 = vld [vmem:[#allocation8 + $0x20] sm:$0xff]  }
  0x6d   :  { %1035 = vmatpush3.bf16.msra.mxu0 %v1156_v9 }
  0x6e   :  { %1036 = vmatprep.subr.bf16.mxu0 %v1157_v10  ;;  %463 = vmatpush1.bf16.msra.mxu1 %v1183_v26  ;;  %v1207_v26 = vld [vmem:[#allocation8 + $0x28] sm:$0xff]  }
  0x6f   :  { %464 = vmatprep.subr.bf16.mxu1 %v1184_v27  ;;  %v1208_v27 = vld [vmem:[#allocation8 + $0x70] sm:$0xff]  }
  0x71   :  { %1037 = vmatpush3.bf16.msra.mxu0 %v1158_v12 }
  0x72   :  { %1038 = vmatprep.subr.bf16.mxu0 %v1159_v13  ;;  %465 = vmatpush1.bf16.msra.mxu1 %v1186_v28  ;;  %v1209_v28 = vld [vmem:[#allocation8 + $0x30] sm:$0xff]  }
  0x73   :  { %466 = vmatprep.subr.bf16.mxu1 %v1187_v32 }
  0x75   :  { %1039 = vmatpush3.bf16.msra.mxu0 %v1160_v16 }
  0x76   :  { %1040 = vmatprep.subr.bf16.mxu0 %v1161_v18  ;;  %467 = vmatpush1.bf16.msra.mxu1 %v1189_v33 }
  0x77   :  { %468 = vmatprep.subr.bf16.mxu1 %v1190_v34  ;;  %v364_v34 = vld [vmem:[%s1612_s4] sm:$0x3] }
  0x79   :  { %1041 = vmatpush3.bf16.msra.mxu0 %v1162_v21 }
  0x7a   :  { %469 = vmatpush1.bf16.msra.mxu1 %v1192_v35  ;;  %1060 = vmatprep.subr.bf16.mxu0 %v1196_v39 }
  0x7b   :  { %470 = vmatprep.subr.bf16.mxu1 %v1193_v36 }
  0x7c   :  { %309 = vmatmul.mubr.bf16.vlgmr.msra.gmra.mrb[0].mxu0 %v1163_v24 }
  0x7d   :  { %316 = vmatprep.mubr.bf16.mxu0 %v1166_v25  ;;  %1061 = vmatpush3.bf16.msra.mxu0 %v1197_v40  ;;  %v1206_v25 = vld [vmem:[#allocation8 + $0x68] sm:$0xff]  }
  0x7e   :  { %471 = vmatpush1.bf16.msra.mxu1 %v1195_v37  ;;  %1062 = vmatprep.subr.bf16.mxu0 %v1198_v41 }
  0x81   :  { %1063 = vmatpush3.bf16.msra.mxu0 %v1199_v42 }
  0x82   :  { %1064 = vmatprep.subr.bf16.mxu0 %v1200_v43 }
  0x84   :  { %317 = vmatmul.mubr.bf16.gmra.mrb[4].mxu0 %v1168_v29  ;;  %v1210_v29 = vld [vmem:[#allocation8 + $0x78] sm:$0xff]  }
  0x85   :  { %324 = vmatprep.mubr.bf16.mxu0 %v1169_v30  ;;  %1065 = vmatpush3.bf16.msra.mxu0 %v1201_v44  ;;  %v1211_v30 = vld [vmem:[#allocation8 + $0x38] sm:$0xff]  }
  0x86   :  { %1066 = vmatprep.subr.bf16.mxu0 %v1202_v45 }
  0x89   :  { %1067 = vmatpush3.bf16.msra.mxu0 %v1203_v46 }
  0x8a   :  { %1068 = vmatprep.subr.bf16.mxu0 %v1204_v47 }
  0x8c   :  { %325 = vmatmul.mubr.bf16.gmra.mrb[8].mxu0 %v1171_v31  ;;  %v366_v31 = vlaneseq }
  0x8d   :  { %1069 = vmatpush3.bf16.msra.mxu0 %v1205_v48 }
  0x8e   :  { %1070 = vmatprep.subr.bf16.mxu0 %v1206_v25  ;;  %v367_v32 = vshrl.u32 %v366_v31, 7  ;;  %v1214_v31 = vld [vmem:[#allocation10 + $0x10] sm:$0xff]  }
  0x90   :  { %v368_v33 = vsub.s32 0, %v367_v32  ;;  %v372_v35 = vsub.s32 1, %v367_v32  ;;  %v1215_v32 = vld [vmem:[#allocation10 + $0x18] sm:$0xff]  }
  0x91   :  { %1071 = vmatpush3.bf16.msra.mxu0 %v1207_v26 }
  0x92   :  { %1072 = vmatprep.subr.bf16.mxu0 %v1208_v27  ;;  %v369_v36 = vrot.slane %v364_v34, %v368_v33  ;;  %v373_v37 = vrot.slane %v364_v34, %v372_v35  ;;  %v1216_v33 = vld [vmem:[#allocation10 + $0x20] sm:$0xff]   ;;  %v1217_v34 = vld [vmem:[#allocation10 + $0x28] sm:$0xff]   ;;  %v1218_v35 = vld [vmem:[#allocation10 + $0x30] sm:$0xff]  }
  0x95   :  { %1073 = vmatpush3.bf16.msra.mxu0 %v1209_v28  ;;  %v1212_v28 = vld [vmem:[#allocation10] sm:$0xff]  }
  0x96   :  { %1074 = vmatprep.subr.bf16.mxu0 %v1210_v29  ;;  %v1418_v29 = vmov 0.0  }
  0x97   :  { %1105 = vmatprep.subr.bf16.mxu1 %v1418_v29 }
  0x99   :  { %1075 = vmatpush3.bf16.msra.mxu0 %v1211_v30  ;;  %v1213_v30 = vld [vmem:[#allocation10 + $0x8] sm:$0xff]  }
 0x14f   :  { %v1042_v49 = vpop.f32.mrb[0].mxu0 }
 0x150   :  { %v1043_v51 = vpop.f32.mrb[1].mxu0 }
 0x151   :  { %v1044_v52 = vadd.f32 %v1043_v51, %v1042_v49  ;;  %v1045_v53 = vpop.f32.mrb[2].mxu0 }
 0x152   :  { %v1046_v54 = vpop.f32.mrb[3].mxu0 }
 0x153   :  { %v311_v55 = vadd.f32 %v1044_v52, %v955_v50  ;;  %v1047_v56 = vadd.f32 %v1046_v54, %v1045_v53 }
 0x155   :  { %v333_v57 = vmul.f32 0.01, %v311_v55  ;;  %v314_v58 = vadd.f32 %v1047_v56, %v955_v50 }
 0x157   :  { %v334_v59 = vmul.f32 0.01, %v314_v58  ;;  %v1048_v60 = vpop.f32.mrb[4].mxu0  ;;  %v339_v62 = vmax.f32 %v311_v55, %v333_v57 }
 0x158   :  { %v1049_v61 = vpop.f32.mrb[5].mxu0 }
 0x159   :  { %v340_v63 = vmax.f32 %v314_v58, %v334_v59  ;;  %v1050_v0 = vadd.f32 %v1049_v61, %v1048_v60  ;;  %v1051_v1 = vpop.f32.mrb[6].mxu0 }
 0x15a   :  { %v1052_v2 = vpop.f32.mrb[7].mxu0 }
 0x15b   :  { %v319_v3 = vadd.f32 %v1050_v0, %v955_v50  ;;  %v1053_v4 = vadd.f32 %v1052_v2, %v1051_v1  ;;  %v345_v5 = vpack.c.bf16 %v340_v63, %v339_v62 }
 0x15d   :  { %v335_v6 = vmul.f32 0.01, %v319_v3  ;;  %v322_v7 = vadd.f32 %v1053_v4, %v955_v50  ;;  %489 = vmatmul.mubr.bf16.vlgmr.msra.gmra.mrb[0].mxu1 %v345_v5 }
 0x15e   :  { %498 = vmatprep.mubr.bf16.mxu1 %v1417_v38  ;;  %1106 = vmatpush3.bf16.msra.mxu1 %v1212_v28 }
 0x15f   :  { %v336_v8 = vmul.f32 0.01, %v322_v7  ;;  %v1054_v9 = vpop.f32.mrb[8].mxu0  ;;  %v341_v11 = vmax.f32 %v319_v3, %v335_v6  ;;  %1107 = vmatprep.subr.bf16.mxu1 %v1418_v29 }
 0x160   :  { %v1055_v10 = vpop.f32.mrb[9].mxu0 }
 0x161   :  { %v342_v12 = vmax.f32 %v322_v7, %v336_v8  ;;  %v1056_v13 = vadd.f32 %v1055_v10, %v1054_v9  ;;  %v1057_v14 = vpop.f32.mrb[10].mxu0 }
 0x162   :  { %v1058_v15 = vpop.f32.mrb[11].mxu0  ;;  %1108 = vmatpush3.bf16.msra.mxu1 %v1213_v30 }
 0x163   :  { %v327_v16 = vadd.f32 %v1056_v13, %v955_v50  ;;  %v1059_v17 = vadd.f32 %v1058_v15, %v1057_v14  ;;  %v346_v18 = vpack.c.bf16 %v342_v12, %v341_v11  ;;  %1109 = vmatprep.subr.bf16.mxu1 %v1418_v29 }
 0x165   :  { %v337_v19 = vmul.f32 0.01, %v327_v16  ;;  %v330_v20 = vadd.f32 %v1059_v17, %v955_v50  ;;  %499 = vmatmul.mubr.bf16.gmra.mrb[4].mxu1 %v346_v18 }
 0x166   :  { %508 = vmatprep.mubr.bf16.mxu1 %v1417_v38  ;;  %1110 = vmatpush3.bf16.msra.mxu1 %v1214_v31 }
 0x167   :  { %v338_v21 = vmul.f32 0.01, %v330_v20  ;;  %v343_v22 = vmax.f32 %v327_v16, %v337_v19  ;;  %1111 = vmatprep.subr.bf16.mxu1 %v1418_v29 }
 0x169   :  { %v344_v23 = vmax.f32 %v330_v20, %v338_v21 }
 0x16a   :  { %1112 = vmatpush3.bf16.msra.mxu1 %v1215_v32 }
 0x16b   :  { %v347_v24 = vpack.c.bf16 %v344_v23, %v343_v22  ;;  %1113 = vmatprep.subr.bf16.mxu1 %v1418_v29 }
 0x16d   :  { %509 = vmatmul.mubr.bf16.gmra.mrb[8].mxu1 %v347_v24 }
 0x16e   :  { %1114 = vmatpush3.bf16.msra.mxu1 %v1216_v33  ;;  %1121 = vmatprep.mubr.msk.bf16.mxu1 %vm1419_vm0, %v1418_v29 }
 0x16f   :  { %1115 = vmatprep.subr.bf16.mxu1 %v1418_v29 }
 0x172   :  { %1116 = vmatpush3.bf16.msra.mxu1 %v1217_v34 }
 0x173   :  { %1117 = vmatprep.subr.bf16.mxu1 %v1418_v29 }
 0x176   :  { %1118 = vmatpush3.bf16.msra.mxu1 %v1218_v35 }
 0x177   :  { %1119 = vmatprep.subr.bf16.mxu1 %v1418_v29 }
 0x230   :  { %v490_v38 = vpop.f32.mrb[0].mxu1 }
 0x231   :  { %v491_v39 = vadd.f32 %v490_v38, %v369_v36  ;;  %v492_v40 = vpop.f32.mrb[1].mxu1  ;;  %v994_v38 = vld [vmem:[%s1614_s6] ss:$0 sm:$0xff]  ;;  %s1420_s6 = smov [#allocation12]  }
 0x232   :  { %v493_v41 = vadd.f32 %v492_v40, %v373_v37  ;;  %v494_v42 = vpop.f32.mrb[2].mxu1  ;;  %s937_s14 = sshll.u32 %s1420_s6, 4  ;;  %s938_s14 = int_to_ptr.vmem [resolvable:$true] %s937_s14 }
 0x233   :  { %v519_v43 = vmul.f32 0.01, %v491_v39  ;;  %v495_v44 = vadd.f32 %v494_v42, %v369_v36  ;;  %v496_v45 = vpop.f32.mrb[3].mxu1  ;;  %s1354_s19 = scalar_lea.vmem %s938_s14, 768  ;;  %p1359_p13 = scmp.lt.s32.totalorder %s938_s14, %s938_s14 }
 0x234   :  { %v520_v46 = vmul.f32 0.01, %v493_v41  ;;  %v497_v47 = vadd.f32 %v496_v45, %v373_v37  ;;  %p1355_p12 = scmp.ne.s32.totalorder %s938_s14, %s1354_s19  ;;  %p1360_p0 = scmp.lt.s32.totalorder %s1354_s19, %s1354_s19 }
 0x235   :  { %v521_v48 = vmul.f32 0.01, %v495_v44  ;;  %v531_v50 = vmax.f32 %v491_v39, %v519_v43 }
 0x236   :  { %v522_v49 = vmul.f32 0.01, %v497_v47  ;;  %v532_v52 = vmax.f32 %v493_v41, %v520_v46  ;;  %p1361_p1 = por %p1360_p0, %p1359_p13 }
 0x237   :  { %v533_v51 = vmax.f32 %v495_v44, %v521_v48 }
 0x238   :  { %v534_v53 = vmax.f32 %v497_v47, %v522_v49  ;;  %v500_v54 = vpop.f32.mrb[4].mxu1  ;;  %p1362_p2 = pnand %p1361_p1, %p1355_p12 }
 0x239   :  { %v543_v55 = vpack.c.bf16 %v533_v51, %v531_v50  ;;  %v501_v56 = vadd.f32 %v500_v54, %v369_v36  ;;  %v502_v57 = vpop.f32.mrb[5].mxu1 }
 0x23a   :  { %v503_v58 = vadd.f32 %v502_v57, %v373_v37  ;;  %v504_v59 = vpop.f32.mrb[6].mxu1  ;;  %v544_v60 = vpack.c.bf16 %v534_v53, %v532_v52 }
 0x23b   :  { %v523_v61 = vmul.f32 0.01, %v501_v56  ;;  %v505_v62 = vadd.f32 %v504_v59, %v369_v36  ;;  %v506_v63 = vpop.f32.mrb[7].mxu1 }
 0x23c   :  { %v524_v0 = vmul.f32 0.01, %v503_v58  ;;  %v507_v1 = vadd.f32 %v506_v63, %v373_v37  ;;  %716 = vmatprep.mubr.bf16.mxu0 %v544_v60 }
 0x23d   :  { %v525_v2 = vmul.f32 0.01, %v505_v62  ;;  %717 = vmatmul.mubr.bf16.vlgmr.msra.gmra.mrb[12].mxu0 %v543_v55  ;;  %v535_v4 = vmax.f32 %v501_v56, %v523_v61 }
 0x23e   :  { %v526_v3 = vmul.f32 0.01, %v507_v1  ;;  %v536_v6 = vmax.f32 %v503_v58, %v524_v0 }
 0x23f   :  { %v537_v5 = vmax.f32 %v505_v62, %v525_v2 }
 0x240   :  { %v538_v7 = vmax.f32 %v507_v1, %v526_v3  ;;  %v510_v8 = vpop.f32.mrb[8].mxu1 }
 0x241   :  { %v511_v9 = vadd.f32 %v510_v8, %v369_v36  ;;  %v512_v10 = vpop.f32.mrb[9].mxu1  ;;  %v545_v11 = vpack.c.bf16 %v537_v5, %v535_v4 }
 0x242   :  { %v513_v12 = vadd.f32 %v512_v10, %v373_v37  ;;  %v514_v13 = vpop.f32.mrb[10].mxu1  ;;  %v546_v14 = vpack.c.bf16 %v538_v7, %v536_v6 }
 0x243   :  { %v527_v15 = vmul.f32 0.01, %v511_v9  ;;  %v515_v16 = vadd.f32 %v514_v13, %v369_v36  ;;  %v516_v17 = vpop.f32.mrb[11].mxu1  ;;  %v1219_v36 = vld [vmem:[#allocation10 + $0x38] sm:$0xff]  }
 0x244   :  { %v528_v18 = vmul.f32 0.01, %v513_v12  ;;  %v517_v19 = vadd.f32 %v516_v17, %v373_v37  ;;  %724 = vmatprep.mubr.bf16.mxu0 %v546_v14  ;;  %1120 = vmatpush3.bf16.msra.mxu1 %v1219_v36 }
 0x245   :  { %v529_v20 = vmul.f32 0.01, %v515_v16  ;;  %725 = vmatmul.mubr.bf16.gmra.mrb[16].mxu0 %v545_v11  ;;  %v539_v22 = vmax.f32 %v511_v9, %v527_v15 }
 0x246   :  { %v530_v21 = vmul.f32 0.01, %v517_v19  ;;  %v540_v24 = vmax.f32 %v513_v12, %v528_v18 }
 0x247   :  { %v541_v23 = vmax.f32 %v515_v16, %v529_v20 }
 0x248   :  { %v542_v25 = vmax.f32 %v517_v19, %v530_v21 }
 0x249   :  { %v547_v26 = vpack.c.bf16 %v541_v23, %v539_v22 }
 0x24a   :  { %v548_v27 = vpack.c.bf16 %v542_v25, %v540_v24 }
 0x24c   :  { %732 = vmatprep.mubr.bf16.mxu0 %v548_v27 }
 0x24d   :  { %733 = vmatmul.mubr.bf16.gmra.mrb[20].mxu0 %v547_v26 }
 0x310   :  { %v1076_v37 = vpop.f32.mrb[12].mxu0 }
 0x311   :  { %v1077_v39 = vpop.f32.mrb[13].mxu0 }
 0x312   :  { %v1078_v40 = vadd.f32 %v1077_v39, %v1076_v37  ;;  %v1079_v41 = vpop.f32.mrb[14].mxu0 }
 0x313   :  { %v1080_v42 = vpop.f32.mrb[15].mxu0 }
 0x314   :  { %v719_v43 = vadd.f32 %v1078_v40, %v994_v38  ;;  %v1081_v44 = vadd.f32 %v1080_v42, %v1079_v41 }
 0x316   :  { %v1011_v45 = vmul.f32 -1.442695, %v719_v43  ;;  %v722_v46 = vadd.f32 %v1081_v44, %v994_v38 }
 0x318   :  { %1220 = vpow2.f32 %v1011_v45  ;;  %v1012_v47 = vmul.f32 -1.442695, %v722_v46  ;;  %v1082_v48 = vpop.f32.mrb[16].mxu0 }
 0x319   :  { %v1083_v49 = vpop.f32.mrb[17].mxu0 }
 0x31a   :  { %1222 = vpow2.f32 %v1012_v47  ;;  %v1084_v50 = vadd.f32 %v1083_v49, %v1082_v48  ;;  %v1085_v51 = vpop.f32.mrb[18].mxu0 }
 0x31b   :  { %v1086_v52 = vpop.f32.mrb[19].mxu0 }
 0x31c   :  { %v727_v53 = vadd.f32 %v1084_v50, %v994_v38  ;;  %v1087_v54 = vadd.f32 %v1086_v52, %v1085_v51 }
 0x31e   :  { %v1013_v55 = vmul.f32 -1.442695, %v727_v53  ;;  %v730_v56 = vadd.f32 %v1087_v54, %v994_v38 }
 0x320   :  { %1224 = vpow2.f32 %v1013_v55  ;;  %v1014_v57 = vmul.f32 -1.442695, %v730_v56  ;;  %v1088_v58 = vpop.f32.mrb[20].mxu0 }
 0x321   :  { %v1089_v59 = vpop.f32.mrb[21].mxu0 }
 0x322   :  { %v1221_v60 = vpop.eup %1220  ;;  %1226 = vpow2.f32 %v1014_v57  ;;  %v1090_v61 = vadd.f32 %v1089_v59, %v1088_v58  ;;  %v1091_v62 = vpop.f32.mrb[22].mxu0 }
 0x323   :  { %v759_v63 = vadd.f32 1.0, %v1221_v60  ;;  %v1092_v0 = vpop.f32.mrb[23].mxu0 }
 0x324   :  { %v1223_v1 = vpop.eup %1222  ;;  %v735_v2 = vadd.f32 %v1090_v61, %v994_v38  ;;  %v1093_v3 = vadd.f32 %v1092_v0, %v1091_v62 }
 0x325   :  { %1228 = vrcp.f32 %v759_v63  ;;  %v760_v4 = vadd.f32 1.0, %v1223_v1 }
 0x326   :  { %v1015_v5 = vmul.f32 -1.442695, %v735_v2  ;;  %v738_v6 = vadd.f32 %v1093_v3, %v994_v38 }
 0x327   :  { %1230 = vrcp.f32 %v760_v4 }
 0x328   :  { %1232 = vpow2.f32 %v1015_v5  ;;  %v1016_v7 = vmul.f32 -1.442695, %v738_v6 }
 0x32a   :  { %v1225_v8 = vpop.eup %1224  ;;  %1234 = vpow2.f32 %v1016_v7 }
 0x32b   :  { %v761_v9 = vadd.f32 1.0, %v1225_v8 }
 0x32c   :  { %v1227_v10 = vpop.eup %1226 }
 0x32d   :  { %1236 = vrcp.f32 %v761_v9  ;;  %v762_v11 = vadd.f32 1.0, %v1227_v10 }
 0x32f   :  { %v1229_v12 = vpop.eup %1228  ;;  %1238 = vrcp.f32 %v762_v11 }
 0x330   :  { %908 = vst [vmem:[#allocation12] sm:$0xff] %v1229_v12 }
 0x331   :  { %v1231_v13 = vpop.eup %1230 }
 0x332   :  { %v1233_v14 = vpop.eup %1232  ;;  %909 = vst [vmem:[#allocation12 + $0x8] sm:$0xff] %v1231_v13  ;;  %v777_v15 = vpack.c.bf16 %v1231_v13, %v1229_v12 }
 0x333   :  { %v763_v16 = vadd.f32 1.0, %v1233_v14 }
 0x334   :  { %v1235_v17 = vpop.eup %1234  ;;  %1122 = vmatmul.mubr.bf16.vlgmr.msra.gmra.mrb[12].mxu1 %v777_v15 }
 0x335   :  { %1240 = vrcp.f32 %v763_v16  ;;  %v764_v18 = vadd.f32 1.0, %v1235_v17  ;;  %1125 = vmatprep.mubr.msk.bf16.mxu1 %vm1419_vm0, %v1418_v29 }
 0x337   :  { %v1237_v19 = vpop.eup %1236  ;;  %1242 = vrcp.f32 %v764_v18 }
 0x338   :  { %910 = vst [vmem:[#allocation12 + $0x10] sm:$0xff] %v1237_v19 }
 0x339   :  { %v1239_v20 = vpop.eup %1238 }
 0x33a   :  { %911 = vst [vmem:[#allocation12 + $0x18] sm:$0xff] %v1239_v20  ;;  %v778_v21 = vpack.c.bf16 %v1239_v20, %v1237_v19 }
 0x33c   :  { %1126 = vmatmul.mubr.bf16.gmra.mrb[16].mxu1 %v778_v21 }
 0x33d   :  { %1129 = vmatprep.mubr.msk.bf16.mxu1 %vm1419_vm0, %v1418_v29 }
 0x33f   :  { %v1241_v22 = vpop.eup %1240 }
 0x340   :  { %912 = vst [vmem:[#allocation12 + $0x20] sm:$0xff] %v1241_v22 }
 0x341   :  { %v1243_v23 = vpop.eup %1242 }
 0x342   :  { %913 = vst [vmem:[#allocation12 + $0x28] sm:$0xff] %v1243_v23  ;;  %v779_v24 = vpack.c.bf16 %v1243_v23, %v1241_v22 }
 0x344   :  { %1130 = vmatmul.mubr.bf16.gmra.mrb[20].mxu1 %v779_v24 }
 0x345   :  { %1365 = shalt.err (!%p1362_p2)
}
 0x346   :  { %s1366_s22 = scalar_lea.hbm %s1618_s10, 768 }
 0x347   :  { %p1367_p3 = scmp.ne.s32.totalorder %s1618_s10, %s1366_s22  ;;  %p1370_p4 = scmp.lt.u32.totalorder %s1366_s22, %s1618_s10 }
 0x349   :  { %p1372_p5 = pnand %p1370_p4, %p1367_p3 }
 0x34b   :  { %1375 = shalt.err (!%p1372_p5)
}
 0x34c   :  { %943 = dma.vmem_to_hbm [thread:$0]  %s938_s14, 768, %s1618_s10, [#allocation13], %s1413_s5, %s1413_s5, %s1414_s28  }
 0x34d   :  { %v1017_v25 = vld [vmem:[%s1616_s8] ss:$0 sm:$0xff]  ;;  %s1421_s10 = smov [#allocation11]  }
 0x34e   :  { %s925_s13 = sshll.u32 %s1421_s10, 4  ;;  %s926_s13 = int_to_ptr.vmem [resolvable:$true] %s925_s13 }
 0x34f   :  { %s1376_s8 = scalar_lea.vmem %s926_s13, 768  ;;  %p1381_p7 = scmp.lt.s32.totalorder %s926_s13, %s926_s13 }
 0x350   :  { %p1377_p6 = scmp.ne.s32.totalorder %s926_s13, %s1376_s8  ;;  %p1382_p8 = scmp.lt.s32.totalorder %s1376_s8, %s1376_s8 }
 0x352   :  { %p1383_p9 = por %p1382_p8, %p1381_p7 }
 0x354   :  { %p1384_p10 = pnand %p1383_p9, %p1377_p6 }
 0x407   :  { %v885_v26 = vpop.f32.mrb[12].mxu1 }
 0x408   :  { %v886_v27 = vadd.f32 %v1017_v25, %v885_v26  ;;  %v1123_v28 = vpop.f32.mrb[13].mxu1 }
 0x409   :  { %v888_v29 = vpop.f32.mrb[14].mxu1 }
 0x40a   :  { %914 = vst [vmem:[#allocation11] sm:$0xff] %v886_v27  ;;  %v889_v30 = vadd.f32 %v1017_v25, %v888_v29  ;;  %v1124_v31 = vpop.f32.mrb[15].mxu1 }
 0x40c   :  { %915 = vst [vmem:[#allocation11 + $0x8] sm:$0xff] %v889_v30 }
 0x40f   :  { %v893_v32 = vpop.f32.mrb[16].mxu1 }
 0x410   :  { %v894_v33 = vadd.f32 %v1017_v25, %v893_v32  ;;  %v1127_v34 = vpop.f32.mrb[17].mxu1 }
 0x411   :  { %v896_v35 = vpop.f32.mrb[18].mxu1 }
 0x412   :  { %916 = vst [vmem:[#allocation11 + $0x10] sm:$0xff] %v894_v33  ;;  %v897_v36 = vadd.f32 %v1017_v25, %v896_v35  ;;  %v1128_v37 = vpop.f32.mrb[19].mxu1 }
 0x414   :  { %917 = vst [vmem:[#allocation11 + $0x18] sm:$0xff] %v897_v36 }
 0x417   :  { %v901_v38 = vpop.f32.mrb[20].mxu1 }
 0x418   :  { %v902_v39 = vadd.f32 %v1017_v25, %v901_v38  ;;  %v1131_v40 = vpop.f32.mrb[21].mxu1 }
 0x419   :  { %v904_v41 = vpop.f32.mrb[22].mxu1 }
 0x41a   :  { %918 = vst [vmem:[#allocation11 + $0x20] sm:$0xff] %v902_v39  ;;  %v905_v42 = vadd.f32 %v1017_v25, %v904_v41  ;;  %v1132_v43 = vpop.f32.mrb[23].mxu1 }
 0x41c   :  { %919 = vst [vmem:[#allocation11 + $0x28] sm:$0xff] %v905_v42 }
 0x41d   :  { %1387 = shalt.err (!%p1384_p10)
}
 0x41e   :  { %s1388_s1 = scalar_lea.hbm %s1617_s9, 768 }
 0x41f   :  { %p1389_p11 = scmp.ne.s32.totalorder %s1617_s9, %s1388_s1  ;;  %p1392_p12 = scmp.lt.u32.totalorder %s1388_s1, %s1617_s9 }
 0x421   :  { %p1394_p13 = pnand %p1392_p12, %p1389_p11 }
 0x423   :  { %1397 = shalt.err (!%p1394_p13)
}
 0x424   :  { %931 = dma.vmem_to_hbm [thread:$0]  %s926_s13, 768, %s1617_s9, [#allocation4], %s1413_s5, %s1413_s5, %s1414_s28  }
 0x425   :  { %1404 = dma.done.wait [#allocation4], 768  }
 0x426   :  { %1405 = vsyncadd [#allocation4], 4294966528 }
 0x427   :  { %1406 = dma.done.wait [#allocation13], 768  }
 0x428   :  { %1407 = vsyncadd [#allocation13], 4294966528 }
 0x429   :  { %950 = vsyncpa [#allocation3], 1 }
 0x42a   :  { %951 = vsyncpa [#allocation6], 1 }
 0x42b   :  { %952 = vsyncpa [#allocation9], 1 }
 0x42c   :  { %953 = vsyncpa [#allocation4], 1 }
 0x42d   :  { %954 = vsyncpa [#allocation13], 1 }

</bundles_post_ra>
